<compile_context>
chip_gen: v6e
topology: v6e:2x2x1
jax: 0.10.0
libtpu: 0.0.40
codegen_flags: <defaults>
</compile_context>

<pallas_src>
import jax
import jax.numpy as jnp
import numpy as np
from jax import lax
from jax.experimental import pallas as pl
from jax.experimental.pallas import tpu as pltpu

_CONSTR_PAD = 128  # lane-dense padding width for the (T, 4) constr output


def copy_generator_kernel(src_ref, dec_ref, ocr_ref, text_ref, frame_ref, obj_ref,
                          gen_w_ref, gen_b_ref, prob_w_ref, prob_b_ref,
                          fcw_ref, fcb_ref,
                          out_log_ref, constr_ref, cdec_ref,
                          attn_sc, prob_sc, m_g_sc, l_g_sc, m_c_sc, l_c_sc):
    Bb, T, D = dec_ref.shape
    S = ocr_ref.shape[1]
    Vt = gen_w_ref.shape[1]
    N = Bb * T
    Tp = cdec_ref.shape[-1]

    p = pl.program_id(1)   # 0: streaming-softmax stats pass, 1: write pass
    v = pl.program_id(2)   # vocab tile index

    dec = dec_ref[...]                       # (Bb, T, D) bf16, resident across (p, v)
    dec_flat = dec.reshape(N, D)

    # -------- V-independent work: runs once per batch block (first grid step) --------
    @pl.when(jnp.logical_and(p == 0, v == 0))
    def _shared():
        ocr = ocr_ref[...]                                                   # (Bb,S,D)
        decode_attn = jnp.einsum("btd,bsd->bts", dec, ocr,
                                 preferred_element_type=jnp.float32)         # (Bb,T,S)
        attn_bf = decode_attn.astype(jnp.bfloat16)
        attn_sc[...] = attn_bf                                               # reused per V tile

        context = jnp.einsum("bts,bsd->btd", attn_bf, ocr,
                             preferred_element_type=jnp.float32)             # (Bb,T,D)
        ctx_bf = context.astype(jnp.bfloat16)

        # copy gate: sigmoid(context @ prob_w + prob_b) as a VPU multiply + lane reduce
        z = (jnp.sum(context.reshape(N, D) * prob_w_ref[...], axis=-1, keepdims=True)
             + prob_b_ref[0, 0])
        prob_sc[...] = 1.0 / (1.0 + jnp.exp(-z))                             # (N, 1)

        # context_dec = log(sigmoid(dec @ context^T / 1000)), stable log-sigmoid
        x = jnp.einsum("btd,bud->btu", dec, ctx_bf,
                       preferred_element_type=jnp.float32) / 1000.0          # (Bb,T,T)
        ls = jnp.minimum(x, 0.0) - jnp.log(1.0 + jnp.exp(-jnp.abs(x)))
        if Tp > T:  # lane-dense store; wrapper slices back to (.., T)
            ls = jnp.concatenate(
                [ls, jnp.zeros((Bb, T, Tp - T), jnp.float32)], axis=-1)
        cdec_ref[...] = ls

        # five fc projections (no jnp.stack) + p=3 normalize along T + cosine constraints
        def proj_norm(x_flat, i):
            y = jnp.dot(x_flat, fcw_ref[i], preferred_element_type=jnp.float32)
            y = (y + fcb_ref[i]).reshape(Bb, T, D)
            a = jnp.abs(y)
            n3 = jnp.sum(a * a * a, axis=1, keepdims=True) ** (1.0 / 3.0)    # (Bb,1,D)
            return y * (1.0 / jnp.maximum(n3, 1e-12))

        dec_n = proj_norm(dec_flat, 0)
        text_n = proj_norm(text_ref[...].reshape(N, D), 1)
        frame_n = proj_norm(frame_ref[...].reshape(N, D), 2)
        obj_n = proj_norm(obj_ref[...].reshape(N, D), 3)
        ctx_n = proj_norm(ctx_bf.reshape(N, D), 4)

        dec_sq = jnp.sum(dec_n * dec_n, axis=-1, keepdims=True)              # (Bb,T,1)

        def cosine(xn):
            dot = jnp.sum(dec_n * xn, axis=-1, keepdims=True)
            return dot * lax.rsqrt(jnp.sum(xn * xn, axis=-1, keepdims=True) * dec_sq)

        constr = jnp.concatenate([cosine(text_n), cosine(frame_n),
                                  cosine(obj_n), cosine(ctx_n)], axis=-1)    # (Bb,T,4)
        s = constr * 0.01
        m = jnp.max(s, axis=-1, keepdims=True)
        lse = jnp.log(jnp.sum(jnp.exp(s - m), axis=-1, keepdims=True))
        constr_log = (s - m) - lse
        pad = jnp.zeros((Bb, T, constr_ref.shape[-1] - 4), jnp.float32)
        constr_ref[...] = jnp.concatenate([constr_log, pad], axis=-1)

        # init streaming-softmax running stats (held in VMEM scratch across V tiles)
        neg_inf = jnp.full((N, 1), -jnp.inf, jnp.float32)
        zeros = jnp.zeros((N, 1), jnp.float32)
        m_g_sc[...] = neg_inf
        m_c_sc[...] = neg_inf
        l_g_sc[...] = zeros
        l_c_sc[...] = zeros

    # -------- per-vocab-tile logits (computed identically in both passes) --------
    gen_tile = (jnp.dot(dec_flat, gen_w_ref[...],
                        preferred_element_type=jnp.float32) + gen_b_ref[...])  # (N,Vt)

    # one-hot built per V tile from the int32 indices (no (B,S,V) tensor anywhere)
    iota_v = lax.broadcasted_iota(jnp.int32, (Bb, S, Vt), 2) + v * Vt
    oh = jnp.where(src_ref[...] == iota_v, 1.0, 0.0).astype(jnp.bfloat16)      # (Bb,S,Vt)
    copy_tile = jnp.einsum("bts,bsv->btv", attn_sc[...], oh,
                           preferred_element_type=jnp.float32).reshape(N, Vt)

    @pl.when(p == 0)
    def _stats():
        m_new = jnp.maximum(m_g_sc[...], jnp.max(gen_tile, axis=-1, keepdims=True))
        l_g_sc[...] = (l_g_sc[...] * jnp.exp(m_g_sc[...] - m_new)
                       + jnp.sum(jnp.exp(gen_tile - m_new), axis=-1, keepdims=True))
        m_g_sc[...] = m_new

        m_new_c = jnp.maximum(m_c_sc[...], jnp.max(copy_tile, axis=-1, keepdims=True))
        l_c_sc[...] = (l_c_sc[...] * jnp.exp(m_c_sc[...] - m_new_c)
                       + jnp.sum(jnp.exp(copy_tile - m_new_c), axis=-1, keepdims=True))
        m_c_sc[...] = m_new_c

    @pl.when(p == 1)
    def _write():
        prob = prob_sc[...]                                     # (N, 1)
        lse_g = m_g_sc[...] + jnp.log(l_g_sc[...])
        lse_c = m_c_sc[...] + jnp.log(l_c_sc[...])
        gen_p = prob * jnp.exp(gen_tile - lse_g)                # exact softmax via LSE
        copy_p = (1.0 - prob) * jnp.exp(copy_tile - lse_c)
        out_log_ref[...] = jnp.log(gen_p + copy_p).reshape(Bb, T, Vt)


def _round_up(x, m):
    return ((x + m - 1) // m) * m


def _target_mxu_rows():
    try:
        kind = jax.devices()[0].device_kind.lower()
    except Exception:
        kind = ""
    return 128 if "v5" in kind else 256     # v5*: 128x128 MXU; v6e/v7x: 256x256


def _vmem_limit_bytes():
    cap = 64 * 1024 * 1024
    try:
        cap = int(pltpu.get_tpu_info().vmem_capacity_bytes)
    except Exception:
        pass
    return max(32 * 1024 * 1024, min(cap * 3 // 4, 100 * 1024 * 1024))


def _pick_block_b(B, T, target_rows):
    bb = max(1, min(B, max(1, target_rows // max(T, 1))))
    if B >= 2:                          # keep >= 2 steps on the "parallel" batch axis
        bb = min(bb, max(1, B // 2))    # so both v7x TensorCores get work
    while B % bb != 0:
        bb -= 1
    return bb


def _pick_block_v(V, max_vt=1024):
    assert V % 128 == 0, "vocab_size must be a multiple of 128 (lane-dense tiling)"
    # TODO(synk): support ragged V by padding gen_w and masking the padded logits.
    vt = min(V, max_vt)
    while V % vt != 0:
        vt -= 128
    return vt


def copy_generator(src_ocr, ocr_vec, decode_output, text_att, frame_att, obj_att,
                   params, block_b=None, block_v=None):
    B, T, D = decode_output.shape
    S = src_ocr.shape[1]
    V = params["gen_w"].shape[1]

    Bb = block_b if block_b is not None else _pick_block_b(B, T, _target_mxu_rows())
    assert B % Bb == 0, "batch block must divide the batch size"
    G = B // Bb
    Vt = block_v if block_v is not None else _pick_block_v(V)
    assert V % Vt == 0
    KV = V // Vt
    Tp = _round_up(T, 128)
    N = Bb * T

    # --- glue / packing (cheap XLA ops) ---
    src_idx = src_ocr.astype(jnp.int32).reshape(B, S, 1)
    to_bf = lambda x: x.astype(jnp.bfloat16)
    dec_bf, ocr_bf = to_bf(decode_output), to_bf(ocr_vec)
    text_bf, frame_bf, obj_bf = to_bf(text_att), to_bf(frame_att), to_bf(obj_att)
    gen_w = to_bf(params["gen_w"])                               # (D, V) bf16
    fcw = to_bf(params["fcw"])                                   # (5, D, D) bf16
    gen_b = params["gen_b"].reshape(1, V).astype(jnp.float32)
    prob_w = params["prob_w"].reshape(1, D).astype(jnp.float32)
    prob_b = params["prob_b"].reshape(1, 1).astype(jnp.float32)
    fcb = params["fcb"].reshape(5, 1, D).astype(jnp.float32)

    def per_b(t2, t3):
        return pl.BlockSpec((Bb, t2, t3), lambda g, p, v: (g, 0, 0))

    def const(shape):
        # Loop-invariant weight blocks.  TODO(synk): add pipeline_mode=pl.Buffered(1)
        # once single-buffered blocks are confirmed on the target jax build.
        n = len(shape)
        return pl.BlockSpec(shape, lambda g, p, v, _n=n: (0,) * _n)

    grid_spec = pltpu.PrefetchScalarGridSpec(
        num_scalar_prefetch=0,
        grid=(G, 2, KV),                      # batch blocks x {stats, write} x V tiles
        in_specs=[
            per_b(S, 1),                      # src_ocr indices (int32)
            per_b(T, D),                      # decode_output (bf16)
            per_b(S, D),                      # ocr_vec (bf16)
            per_b(T, D),                      # text_att (bf16)
            per_b(T, D),                      # frame_att (bf16)
            per_b(T, D),                      # obj_att (bf16)
            pl.BlockSpec((D, Vt), lambda g, p, v: (0, v)),       # gen_proj weight tile
            pl.BlockSpec((1, Vt), lambda g, p, v: (0, v)),       # gen_proj bias tile
            const((1, D)),                                       # prob_proj weight row
            pl.BlockSpec(memory_space=pltpu.MemorySpace.SMEM),   # prob_proj bias (1,1)
            const((5, D, D)),                 # fc_{decoder,text,frame,obj,context} W
            const((5, 1, D)),                 # fc biases
        ],
        out_specs=[
            # p*v pins the out block during the stats pass (no garbage writebacks);
            # the write pass (p==1) then walks the V tiles.
            pl.BlockSpec((Bb, T, Vt), lambda g, p, v: (g, 0, p * v)),
            per_b(T, _CONSTR_PAD),            # constr (lane-padded; sliced below)
            per_b(T, Tp),                     # context_dec (lane-padded; sliced below)
        ],
        scratch_shapes=[
            pltpu.VMEM((Bb, T, S), jnp.bfloat16),   # decode_attn, reused per V tile
            pltpu.VMEM((N, 1), jnp.float32),        # copy gate prob
            pltpu.VMEM((N, 1), jnp.float32),        # gen softmax running max
            pltpu.VMEM((N, 1), jnp.float32),        # gen softmax running denom
            pltpu.VMEM((N, 1), jnp.float32),        # copy softmax running max
            pltpu.VMEM((N, 1), jnp.float32),        # copy softmax running denom
        ],
    )

    # TODO(synk): emit out_log / context_dec as bf16 if downstream tolerates it
    # (halves the dominant HBM writeback stream on v5e/v6e).
    out_shape = (
        jax.ShapeDtypeStruct((B, T, V), jnp.float32),
        jax.ShapeDtypeStruct((B, T, _CONSTR_PAD), jnp.float32),
        jax.ShapeDtypeStruct((B, T, Tp), jnp.float32),
    )

    args = (src_idx, dec_bf, ocr_bf, text_bf, frame_bf, obj_bf,
            gen_w, gen_b, prob_w, prob_b, fcw, fcb)

    flops = (2 * B * T * (2 * S * D + T * D + 5 * D * D + D)
             + 4 * B * T * V * (D + S))       # gen/copy matmuls run in both passes
    transcendentals = B * T * (4 * V + T + 5 * D + 16)
    bytes_accessed = int(sum(int(a.size) * a.dtype.itemsize for a in args)
                         + (2 * G - 1) * D * V * 2        # gen_w re-streamed per pass
                         + B * T * (V + _CONSTR_PAD + Tp) * 4)

    out_log, constr_pad, cdec_pad = pl.pallas_call(
        copy_generator_kernel,
        grid_spec=grid_spec,
        out_shape=out_shape,
        compiler_params=pltpu.CompilerParams(
            dimension_semantics=("parallel", "arbitrary", "arbitrary"),
            vmem_limit_bytes=_vmem_limit_bytes(),
        ),
        cost_estimate=pl.CostEstimate(
            flops=int(flops),
            transcendentals=int(transcendentals),
            bytes_accessed=int(bytes_accessed),
        ),
    )(*args)

    return out_log, constr_pad[:, :, :4], cdec_pad[:, :, :T]


def reference(src_ocr, ocr_vec, dec, text, frame, obj, params):
    """Pure-JAX (f32) re-implementation for correctness checking."""
    V = params["gen_w"].shape[1]
    oh = jax.nn.one_hot(src_ocr, V, dtype=jnp.float32)
    decode_attn = jnp.einsum("btd,bsd->bts", dec, ocr_vec)
    context = jnp.einsum("bts,bsd->btd", decode_attn, ocr_vec)
    prob = jax.nn.sigmoid(context @ params["prob_w"] + params["prob_b"])
    cdec = jnp.log(jax.nn.sigmoid(jnp.einsum("btd,bud->btu", dec, context) / 1000.0))
    gen = prob * jax.nn.softmax(dec @ params["gen_w"] + params["gen_b"], axis=-1)
    copy = jnp.einsum("bts,bsv->btv", decode_attn, oh)
    copy = (1.0 - prob) * jax.nn.softmax(copy, axis=-1)
    out_log = jnp.log(copy + gen)

    def lin(x, i):
        return x @ params["fcw"][i] + params["fcb"][i]

    dec_f, text_f, frame_f = lin(dec, 0), lin(text, 1), lin(frame, 2)
    obj_f, ctx_f = lin(obj, 3), lin(context, 4)

    def norm3(x):
        n = jnp.sum(jnp.abs(x) ** 3, axis=1, keepdims=True) ** (1.0 / 3.0)
        return x / jnp.maximum(n, 1e-12)

    dec_n, text_n, frame_n, obj_n, ctx_n = map(norm3, (dec_f, text_f, frame_f, obj_f, ctx_f))
    dec_s = jnp.sqrt(jnp.sum(dec_n * dec_n, axis=2))

    def pr(x):
        dot = jnp.sum(dec_n * x, axis=2)
        nrm = jnp.sqrt(jnp.sum(x * x, axis=2)) * dec_s
        return dot / nrm

    constr = jnp.stack([pr(text_n), pr(frame_n), pr(obj_n), pr(ctx_n)], axis=2)
    constr = jnp.log(jax.nn.softmax(constr * 0.01, axis=2))
    return out_log, constr, cdec


if __name__ == "__main__":
    B, T, S, D, V = 2, 8, 8, 32, 128  # batch, steps, ocr_len, d_model, vocab_size

    key = jax.random.PRNGKey(0)
    ks = jax.random.split(key, 12)
    src_ocr = jax.random.randint(ks[0], (B, S), 0, V, dtype=jnp.int32)
    ocr_vec = 0.1 * jax.random.normal(ks[1], (B, S, D), jnp.float32)
    decode_output = 0.1 * jax.random.normal(ks[2], (B, T, D), jnp.float32)
    text_att = 0.1 * jax.random.normal(ks[3], (B, T, D), jnp.float32)
    frame_att = 0.1 * jax.random.normal(ks[4], (B, T, D), jnp.float32)
    obj_att = 0.1 * jax.random.normal(ks[5], (B, T, D), jnp.float32)

    params = {
        "gen_w": 0.1 * jax.random.normal(ks[6], (D, V), jnp.float32),
        "gen_b": 0.1 * jax.random.normal(ks[7], (V,), jnp.float32),
        "prob_w": 0.1 * jax.random.normal(ks[8], (D, 1), jnp.float32),
        "prob_b": 0.1 * jax.random.normal(ks[9], (1,), jnp.float32),
        "fcw": 0.1 * jax.random.normal(ks[10], (5, D, D), jnp.float32),
        "fcb": 0.1 * jax.random.normal(ks[11], (5, D), jnp.float32),
    }

    out_log, constr_out, context_dec = copy_generator(
        src_ocr, ocr_vec, decode_output, text_att, frame_att, obj_att, params)
    jax.block_until_ready((out_log, constr_out, context_dec))

    ref_log, ref_constr, ref_cdec = reference(
        src_ocr, ocr_vec, decode_output, text_att, frame_att, obj_att, params)
    # bf16 matmul operands -> slightly looser tolerance
    np.testing.assert_allclose(np.asarray(out_log), np.asarray(ref_log), rtol=1e-2, atol=1e-2)
    np.testing.assert_allclose(np.asarray(constr_out), np.asarray(ref_constr), rtol=1e-2, atol=1e-2)
    np.testing.assert_allclose(np.asarray(context_dec), np.asarray(ref_cdec), rtol=1e-2, atol=1e-2)

    print("KERNEL_OK")
</pallas_src>

<mosaic_0001>
module attributes {stable_mosaic.version = 11 : i64} {
  func.func @copy_generator_kernel(%arg0: i32, %arg1: i32, %arg2: i32, %arg3: memref<1x8x1xi32, #tpu.memory_space<vmem>>, %arg4: memref<1x8x32xbf16, #tpu.memory_space<vmem>>, %arg5: memref<1x8x32xbf16, #tpu.memory_space<vmem>>, %arg6: memref<1x8x32xbf16, #tpu.memory_space<vmem>>, %arg7: memref<1x8x32xbf16, #tpu.memory_space<vmem>>, %arg8: memref<1x8x32xbf16, #tpu.memory_space<vmem>>, %arg9: memref<32x128xbf16, #tpu.memory_space<vmem>>, %arg10: memref<1x128xf32, #tpu.memory_space<vmem>>, %arg11: memref<1x32xf32, #tpu.memory_space<vmem>>, %arg12: memref<1x1xf32, #tpu.memory_space<smem>>, %arg13: memref<5x32x32xbf16, #tpu.memory_space<vmem>>, %arg14: memref<5x1x32xf32, #tpu.memory_space<vmem>>, %arg15: memref<1x8x128xf32, #tpu.memory_space<vmem>>, %arg16: memref<1x8x128xf32, #tpu.memory_space<vmem>>, %arg17: memref<1x8x128xf32, #tpu.memory_space<vmem>>, %arg18: memref<1x8x8xbf16, #tpu.memory_space<vmem>>, %arg19: memref<8x1xf32, #tpu.memory_space<vmem>>, %arg20: memref<8x1xf32, #tpu.memory_space<vmem>>, %arg21: memref<8x1xf32, #tpu.memory_space<vmem>>, %arg22: memref<8x1xf32, #tpu.memory_space<vmem>>, %arg23: memref<8x1xf32, #tpu.memory_space<vmem>>) attributes {dimension_semantics = [#tpu.dimension_semantics<parallel>, #tpu.dimension_semantics<arbitrary>, #tpu.dimension_semantics<arbitrary>], iteration_bounds = array<i64: 2, 2, 1>, scalar_prefetch = 0 : i64, scratch_operands = 6 : i64, tpu.core_type = #tpu.core_type<tc>, window_params = [{transform_indices = @transform_0, window_bounds = array<i64: 1, 8, 1>}, {transform_indices = @transform_1, window_bounds = array<i64: 1, 8, 32>}, {transform_indices = @transform_2, window_bounds = array<i64: 1, 8, 32>}, {transform_indices = @transform_3, window_bounds = array<i64: 1, 8, 32>}, {transform_indices = @transform_4, window_bounds = array<i64: 1, 8, 32>}, {transform_indices = @transform_5, window_bounds = array<i64: 1, 8, 32>}, {transform_indices = @transform_6, window_bounds = array<i64: 32, 128>}, {transform_indices = @transform_7, window_bounds = array<i64: 1, 128>}, {pipeline_mode = #tpu.pipeline_mode<synchronous>, transform_indices = @transform_8, window_bounds = array<i64: 1, 32>}, {transform_indices = @transform_9, window_bounds = array<i64: 1, 1>}, {pipeline_mode = #tpu.pipeline_mode<synchronous>, transform_indices = @transform_10, window_bounds = array<i64: 5, 32, 32>}, {pipeline_mode = #tpu.pipeline_mode<synchronous>, transform_indices = @transform_11, window_bounds = array<i64: 5, 1, 32>}, {transform_indices = @transform_12, window_bounds = array<i64: 1, 8, 128>}, {transform_indices = @transform_13, window_bounds = array<i64: 1, 8, 128>}, {transform_indices = @transform_14, window_bounds = array<i64: 1, 8, 128>}]} {
    %c0 = arith.constant 0 : index
    %c0_0 = arith.constant 0 : index
    %c0_1 = arith.constant 0 : index
    %0 = vector.load %arg4[%c0, %c0_0, %c0_1] : memref<1x8x32xbf16, #tpu.memory_space<vmem>>, vector<1x8x32xbf16>
    %1 = vector.shape_cast %0 : vector<1x8x32xbf16> to vector<8x32xbf16>
    %c0_i32 = arith.constant 0 : i32
    %2 = arith.cmpi eq, %arg1, %c0_i32 : i32
    %c0_i32_2 = arith.constant 0 : i32
    %3 = arith.cmpi eq, %arg2, %c0_i32_2 : i32
    %4 = arith.andi %2, %3 : i1
    %5 = arith.extui %4 : i1 to i32
    %c0_i32_3 = arith.constant 0 : i32
    %6 = arith.cmpi ne, %5, %c0_i32_3 : i32
    scf.if %6 {
      %c0_20 = arith.constant 0 : index
      %c0_21 = arith.constant 0 : index
      %c0_22 = arith.constant 0 : index
      %32 = vector.load %arg5[%c0_20, %c0_21, %c0_22] : memref<1x8x32xbf16, #tpu.memory_space<vmem>>, vector<1x8x32xbf16>
      "tpu.trace_start"() <{level = 10 : i32, message = "btd,bsd->bts"}> : () -> ()
      %cst_23 = arith.constant dense<0.000000e+00> : vector<1x8x8xf32>
      %33 = tpu.matmul %0, %32, %cst_23 {dimension_numbers = #tpu.dot_dimension_numbers<[2], [2], [1], [1], [0, 0, 0, 1, 1, 1], [0], [0]>} : vector<1x8x32xbf16>, vector<1x8x32xbf16>, vector<1x8x8xf32> -> vector<1x8x8xf32>
      "tpu.trace_stop"() : () -> ()
      %34 = arith.truncf %33 : vector<1x8x8xf32> to vector<1x8x8xbf16>
      %c0_24 = arith.constant 0 : index
      %c0_25 = arith.constant 0 : index
      %c0_26 = arith.constant 0 : index
      %35 = vector.load %arg18[%c0_24, %c0_25, %c0_26] : memref<1x8x8xbf16, #tpu.memory_space<vmem>>, vector<1x8x8xbf16>
      tpu.vector_store %arg18[%c0_24, %c0_25, %c0_26], %34 {strides = array<i32>} : memref<1x8x8xbf16, #tpu.memory_space<vmem>>, vector<1x8x8xbf16>,
      "tpu.trace_start"() <{level = 10 : i32, message = "bts,bsd->btd"}> : () -> ()
      %cst_27 = arith.constant dense<0.000000e+00> : vector<1x8x32xf32>
      %36 = tpu.matmul %34, %32, %cst_27 {dimension_numbers = #tpu.dot_dimension_numbers<[2], [1], [1], [2], [0, 0, 0, 1, 1, 2], [0], [0]>} : vector<1x8x8xbf16>, vector<1x8x32xbf16>, vector<1x8x32xf32> -> vector<1x8x32xf32>
      "tpu.trace_stop"() : () -> ()
      %37 = arith.truncf %36 : vector<1x8x32xf32> to vector<1x8x32xbf16>
      %38 = vector.shape_cast %36 : vector<1x8x32xf32> to vector<8x32xf32>
      %c0_28 = arith.constant 0 : index
      %c0_29 = arith.constant 0 : index
      %39 = vector.load %arg11[%c0_28, %c0_29] : memref<1x32xf32, #tpu.memory_space<vmem>>, vector<1x32xf32>
      %40 = vector.broadcast %39 : vector<1x32xf32> to vector<8x32xf32>
      %41 = arith.mulf %38, %40 : vector<8x32xf32>
      %cst_30 = arith.constant dense<0.000000e+00> : vector<8xf32>
      %42 = vector.multi_reduction <add>, %41, %cst_30 [1] : vector<8x32xf32> to vector<8xf32>
      %43 = vector.shape_cast %42 : vector<8xf32> to vector<8x1xf32>
      %c0_31 = arith.constant 0 : index
      %c0_32 = arith.constant 0 : index
      %44 = memref.load %arg12[%c0_31, %c0_32] : memref<1x1xf32, #tpu.memory_space<smem>>
      %45 = vector.broadcast %44 : f32 to vector<8x1xf32>
      %46 = arith.addf %43, %45 : vector<8x1xf32>
      %cst_33 = arith.constant 0.000000e+00 : f32
      %47 = vector.broadcast %cst_33 : f32 to vector<8x1xf32>
      %48 = arith.subf %47, %46 : vector<8x1xf32>
      %49 = math.exp %48 : vector<8x1xf32>
      %cst_34 = arith.constant 1.000000e+00 : f32
      %50 = vector.broadcast %cst_34 : f32 to vector<8x1xf32>
      %51 = arith.addf %50, %49 : vector<8x1xf32>
      %cst_35 = arith.constant 1.000000e+00 : f32
      %52 = vector.broadcast %cst_35 : f32 to vector<8x1xf32>
      %53 = arith.divf %52, %51 : vector<8x1xf32>
      %c0_36 = arith.constant 0 : index
      %c0_37 = arith.constant 0 : index
      %54 = vector.load %arg19[%c0_36, %c0_37] : memref<8x1xf32, #tpu.memory_space<vmem>>, vector<8x1xf32>
      tpu.vector_store %arg19[%c0_36, %c0_37], %53 {strides = array<i32>} : memref<8x1xf32, #tpu.memory_space<vmem>>, vector<8x1xf32>,
      "tpu.trace_start"() <{level = 10 : i32, message = "btd,bud->btu"}> : () -> ()
      %cst_38 = arith.constant dense<0.000000e+00> : vector<1x8x8xf32>
      %55 = tpu.matmul %0, %37, %cst_38 {dimension_numbers = #tpu.dot_dimension_numbers<[2], [2], [1], [1], [0, 0, 0, 1, 1, 1], [0], [0]>} : vector<1x8x32xbf16>, vector<1x8x32xbf16>, vector<1x8x8xf32> -> vector<1x8x8xf32>
      "tpu.trace_stop"() : () -> ()
      %cst_39 = arith.constant 1.000000e+03 : f32
      %56 = vector.broadcast %cst_39 : f32 to vector<1x8x8xf32>
      %57 = arith.divf %55, %56 : vector<1x8x8xf32>
      %cst_40 = arith.constant 0.000000e+00 : f32
      %58 = vector.broadcast %cst_40 : f32 to vector<1x8x8xf32>
      %59 = arith.minimumf %57, %58 : vector<1x8x8xf32>
      %60 = math.absf %57 : vector<1x8x8xf32>
      %cst_41 = arith.constant 0.000000e+00 : f32
      %61 = vector.broadcast %cst_41 : f32 to vector<1x8x8xf32>
      %62 = arith.subf %61, %60 : vector<1x8x8xf32>
      %63 = math.exp %62 : vector<1x8x8xf32>
      %cst_42 = arith.constant 1.000000e+00 : f32
      %64 = vector.broadcast %cst_42 : f32 to vector<1x8x8xf32>
      %65 = arith.addf %64, %63 : vector<1x8x8xf32>
      %66 = math.log %65 : vector<1x8x8xf32>
      %67 = arith.subf %59, %66 : vector<1x8x8xf32>
      %cst_43 = arith.constant 0.000000e+00 : f32
      %68 = vector.broadcast %cst_43 : f32 to vector<1x8x120xf32>
      %69 = tpu.concatenate %67, %68 in 2 : vector<1x8x8xf32>, vector<1x8x120xf32> -> vector<1x8x128xf32>
      %c0_44 = arith.constant 0 : index
      %c0_45 = arith.constant 0 : index
      %c0_46 = arith.constant 0 : index
      %70 = vector.load %arg17[%c0_44, %c0_45, %c0_46] : memref<1x8x128xf32, #tpu.memory_space<vmem>>, vector<1x8x128xf32>
      tpu.vector_store %arg17[%c0_44, %c0_45, %c0_46], %69 {strides = array<i32>} : memref<1x8x128xf32, #tpu.memory_space<vmem>>, vector<1x8x128xf32>,
      %c0_47 = arith.constant 0 : index
      %c0_48 = arith.constant 0 : index
      %c0_49 = arith.constant 0 : index
      %71 = vector.load %arg13[%c0_47, %c0_48, %c0_49] : memref<5x32x32xbf16, #tpu.memory_space<vmem>>, vector<1x32x32xbf16>
      %72 = vector.shape_cast %71 : vector<1x32x32xbf16> to vector<32x32xbf16>
      %cst_50 = arith.constant dense<0.000000e+00> : vector<8x32xf32>
      %73 = tpu.matmul %1, %72, %cst_50 {dimension_numbers = #tpu.dot_dimension_numbers<[1], [0], [0], [1], [0, 0, 1, 1], [], []>} : vector<8x32xbf16>, vector<32x32xbf16>, vector<8x32xf32> -> vector<8x32xf32>
      %c0_51 = arith.constant 0 : index
      %c0_52 = arith.constant 0 : index
      %c0_53 = arith.constant 0 : index
      %74 = vector.load %arg14[%c0_51, %c0_52, %c0_53] : memref<5x1x32xf32, #tpu.memory_space<vmem>>, vector<1x1x32xf32>
      %75 = vector.shape_cast %74 : vector<1x1x32xf32> to vector<1x32xf32>
      %76 = vector.broadcast %75 : vector<1x32xf32> to vector<8x32xf32>
      %77 = arith.addf %73, %76 : vector<8x32xf32>
      %78 = vector.shape_cast %77 : vector<8x32xf32> to vector<1x8x32xf32>
      %79 = math.absf %78 : vector<1x8x32xf32>
      %80 = arith.mulf %79, %79 : vector<1x8x32xf32>
      %81 = arith.mulf %80, %79 : vector<1x8x32xf32>
      %cst_54 = arith.constant dense<0.000000e+00> : vector<1x32xf32>
      %82 = vector.multi_reduction <add>, %81, %cst_54 [1] : vector<1x8x32xf32> to vector<1x32xf32>
      %83 = vector.shape_cast %82 : vector<1x32xf32> to vector<1x1x32xf32>
      %cst_55 = arith.constant 0.333333343 : f32
      %84 = vector.broadcast %cst_55 : f32 to vector<1x1x32xf32>
      %85 = math.powf %83, %84 : vector<1x1x32xf32>
      %cst_56 = arith.constant 9.99999996E-13 : f32
      %86 = vector.broadcast %cst_56 : f32 to vector<1x1x32xf32>
      %87 = arith.maximumf %85, %86 : vector<1x1x32xf32>
      %cst_57 = arith.constant 1.000000e+00 : f32
      %88 = vector.broadcast %cst_57 : f32 to vector<1x1x32xf32>
      %89 = arith.divf %88, %87 : vector<1x1x32xf32>
      %90 = vector.broadcast %89 : vector<1x1x32xf32> to vector<1x8x32xf32>
      %91 = arith.mulf %78, %90 : vector<1x8x32xf32>
      %c0_58 = arith.constant 0 : index
      %c0_59 = arith.constant 0 : index
      %c0_60 = arith.constant 0 : index
      %92 = vector.load %arg6[%c0_58, %c0_59, %c0_60] : memref<1x8x32xbf16, #tpu.memory_space<vmem>>, vector<1x8x32xbf16>
      %93 = vector.shape_cast %92 : vector<1x8x32xbf16> to vector<8x32xbf16>
      %c1 = arith.constant 1 : index
      %c0_61 = arith.constant 0 : index
      %c0_62 = arith.constant 0 : index
      %94 = vector.load %arg13[%c1, %c0_61, %c0_62] : memref<5x32x32xbf16, #tpu.memory_space<vmem>>, vector<1x32x32xbf16>
      %95 = vector.shape_cast %94 : vector<1x32x32xbf16> to vector<32x32xbf16>
      %cst_63 = arith.constant dense<0.000000e+00> : vector<8x32xf32>
      %96 = tpu.matmul %93, %95, %cst_63 {dimension_numbers = #tpu.dot_dimension_numbers<[1], [0], [0], [1], [0, 0, 1, 1], [], []>} : vector<8x32xbf16>, vector<32x32xbf16>, vector<8x32xf32> -> vector<8x32xf32>
      %c1_64 = arith.constant 1 : index
      %c0_65 = arith.constant 0 : index
      %c0_66 = arith.constant 0 : index
      %97 = vector.load %arg14[%c1_64, %c0_65, %c0_66] : memref<5x1x32xf32, #tpu.memory_space<vmem>>, vector<1x1x32xf32>
      %98 = vector.shape_cast %97 : vector<1x1x32xf32> to vector<1x32xf32>
      %99 = vector.broadcast %98 : vector<1x32xf32> to vector<8x32xf32>
      %100 = arith.addf %96, %99 : vector<8x32xf32>
      %101 = vector.shape_cast %100 : vector<8x32xf32> to vector<1x8x32xf32>
      %102 = math.absf %101 : vector<1x8x32xf32>
      %103 = arith.mulf %102, %102 : vector<1x8x32xf32>
      %104 = arith.mulf %103, %102 : vector<1x8x32xf32>
      %cst_67 = arith.constant dense<0.000000e+00> : vector<1x32xf32>
      %105 = vector.multi_reduction <add>, %104, %cst_67 [1] : vector<1x8x32xf32> to vector<1x32xf32>
      %106 = vector.shape_cast %105 : vector<1x32xf32> to vector<1x1x32xf32>
      %cst_68 = arith.constant 0.333333343 : f32
      %107 = vector.broadcast %cst_68 : f32 to vector<1x1x32xf32>
      %108 = math.powf %106, %107 : vector<1x1x32xf32>
      %cst_69 = arith.constant 9.99999996E-13 : f32
      %109 = vector.broadcast %cst_69 : f32 to vector<1x1x32xf32>
      %110 = arith.maximumf %108, %109 : vector<1x1x32xf32>
      %cst_70 = arith.constant 1.000000e+00 : f32
      %111 = vector.broadcast %cst_70 : f32 to vector<1x1x32xf32>
      %112 = arith.divf %111, %110 : vector<1x1x32xf32>
      %113 = vector.broadcast %112 : vector<1x1x32xf32> to vector<1x8x32xf32>
      %114 = arith.mulf %101, %113 : vector<1x8x32xf32>
      %c0_71 = arith.constant 0 : index
      %c0_72 = arith.constant 0 : index
      %c0_73 = arith.constant 0 : index
      %115 = vector.load %arg7[%c0_71, %c0_72, %c0_73] : memref<1x8x32xbf16, #tpu.memory_space<vmem>>, vector<1x8x32xbf16>
      %116 = vector.shape_cast %115 : vector<1x8x32xbf16> to vector<8x32xbf16>
      %c2 = arith.constant 2 : index
      %c0_74 = arith.constant 0 : index
      %c0_75 = arith.constant 0 : index
      %117 = vector.load %arg13[%c2, %c0_74, %c0_75] : memref<5x32x32xbf16, #tpu.memory_space<vmem>>, vector<1x32x32xbf16>
      %118 = vector.shape_cast %117 : vector<1x32x32xbf16> to vector<32x32xbf16>
      %cst_76 = arith.constant dense<0.000000e+00> : vector<8x32xf32>
      %119 = tpu.matmul %116, %118, %cst_76 {dimension_numbers = #tpu.dot_dimension_numbers<[1], [0], [0], [1], [0, 0, 1, 1], [], []>} : vector<8x32xbf16>, vector<32x32xbf16>, vector<8x32xf32> -> vector<8x32xf32>
      %c2_77 = arith.constant 2 : index
      %c0_78 = arith.constant 0 : index
      %c0_79 = arith.constant 0 : index
      %120 = vector.load %arg14[%c2_77, %c0_78, %c0_79] : memref<5x1x32xf32, #tpu.memory_space<vmem>>, vector<1x1x32xf32>
      %121 = vector.shape_cast %120 : vector<1x1x32xf32> to vector<1x32xf32>
      %122 = vector.broadcast %121 : vector<1x32xf32> to vector<8x32xf32>
      %123 = arith.addf %119, %122 : vector<8x32xf32>
      %124 = vector.shape_cast %123 : vector<8x32xf32> to vector<1x8x32xf32>
      %125 = math.absf %124 : vector<1x8x32xf32>
      %126 = arith.mulf %125, %125 : vector<1x8x32xf32>
      %127 = arith.mulf %126, %125 : vector<1x8x32xf32>
      %cst_80 = arith.constant dense<0.000000e+00> : vector<1x32xf32>
      %128 = vector.multi_reduction <add>, %127, %cst_80 [1] : vector<1x8x32xf32> to vector<1x32xf32>
      %129 = vector.shape_cast %128 : vector<1x32xf32> to vector<1x1x32xf32>
      %cst_81 = arith.constant 0.333333343 : f32
      %130 = vector.broadcast %cst_81 : f32 to vector<1x1x32xf32>
      %131 = math.powf %129, %130 : vector<1x1x32xf32>
      %cst_82 = arith.constant 9.99999996E-13 : f32
      %132 = vector.broadcast %cst_82 : f32 to vector<1x1x32xf32>
      %133 = arith.maximumf %131, %132 : vector<1x1x32xf32>
      %cst_83 = arith.constant 1.000000e+00 : f32
      %134 = vector.broadcast %cst_83 : f32 to vector<1x1x32xf32>
      %135 = arith.divf %134, %133 : vector<1x1x32xf32>
      %136 = vector.broadcast %135 : vector<1x1x32xf32> to vector<1x8x32xf32>
      %137 = arith.mulf %124, %136 : vector<1x8x32xf32>
      %c0_84 = arith.constant 0 : index
      %c0_85 = arith.constant 0 : index
      %c0_86 = arith.constant 0 : index
      %138 = vector.load %arg8[%c0_84, %c0_85, %c0_86] : memref<1x8x32xbf16, #tpu.memory_space<vmem>>, vector<1x8x32xbf16>
      %139 = vector.shape_cast %138 : vector<1x8x32xbf16> to vector<8x32xbf16>
      %c3 = arith.constant 3 : index
      %c0_87 = arith.constant 0 : index
      %c0_88 = arith.constant 0 : index
      %140 = vector.load %arg13[%c3, %c0_87, %c0_88] : memref<5x32x32xbf16, #tpu.memory_space<vmem>>, vector<1x32x32xbf16>
      %141 = vector.shape_cast %140 : vector<1x32x32xbf16> to vector<32x32xbf16>
      %cst_89 = arith.constant dense<0.000000e+00> : vector<8x32xf32>
      %142 = tpu.matmul %139, %141, %cst_89 {dimension_numbers = #tpu.dot_dimension_numbers<[1], [0], [0], [1], [0, 0, 1, 1], [], []>} : vector<8x32xbf16>, vector<32x32xbf16>, vector<8x32xf32> -> vector<8x32xf32>
      %c3_90 = arith.constant 3 : index
      %c0_91 = arith.constant 0 : index
      %c0_92 = arith.constant 0 : index
      %143 = vector.load %arg14[%c3_90, %c0_91, %c0_92] : memref<5x1x32xf32, #tpu.memory_space<vmem>>, vector<1x1x32xf32>
      %144 = vector.shape_cast %143 : vector<1x1x32xf32> to vector<1x32xf32>
      %145 = vector.broadcast %144 : vector<1x32xf32> to vector<8x32xf32>
      %146 = arith.addf %142, %145 : vector<8x32xf32>
      %147 = vector.shape_cast %146 : vector<8x32xf32> to vector<1x8x32xf32>
      %148 = math.absf %147 : vector<1x8x32xf32>
      %149 = arith.mulf %148, %148 : vector<1x8x32xf32>
      %150 = arith.mulf %149, %148 : vector<1x8x32xf32>
      %cst_93 = arith.constant dense<0.000000e+00> : vector<1x32xf32>
      %151 = vector.multi_reduction <add>, %150, %cst_93 [1] : vector<1x8x32xf32> to vector<1x32xf32>
      %152 = vector.shape_cast %151 : vector<1x32xf32> to vector<1x1x32xf32>
      %cst_94 = arith.constant 0.333333343 : f32
      %153 = vector.broadcast %cst_94 : f32 to vector<1x1x32xf32>
      %154 = math.powf %152, %153 : vector<1x1x32xf32>
      %cst_95 = arith.constant 9.99999996E-13 : f32
      %155 = vector.broadcast %cst_95 : f32 to vector<1x1x32xf32>
      %156 = arith.maximumf %154, %155 : vector<1x1x32xf32>
      %cst_96 = arith.constant 1.000000e+00 : f32
      %157 = vector.broadcast %cst_96 : f32 to vector<1x1x32xf32>
      %158 = arith.divf %157, %156 : vector<1x1x32xf32>
      %159 = vector.broadcast %158 : vector<1x1x32xf32> to vector<1x8x32xf32>
      %160 = arith.mulf %147, %159 : vector<1x8x32xf32>
      %161 = vector.shape_cast %37 : vector<1x8x32xbf16> to vector<8x32xbf16>
      %c4 = arith.constant 4 : index
      %c0_97 = arith.constant 0 : index
      %c0_98 = arith.constant 0 : index
      %162 = vector.load %arg13[%c4, %c0_97, %c0_98] : memref<5x32x32xbf16, #tpu.memory_space<vmem>>, vector<1x32x32xbf16>
      %163 = vector.shape_cast %162 : vector<1x32x32xbf16> to vector<32x32xbf16>
      %cst_99 = arith.constant dense<0.000000e+00> : vector<8x32xf32>
      %164 = tpu.matmul %161, %163, %cst_99 {dimension_numbers = #tpu.dot_dimension_numbers<[1], [0], [0], [1], [0, 0, 1, 1], [], []>} : vector<8x32xbf16>, vector<32x32xbf16>, vector<8x32xf32> -> vector<8x32xf32>
      %c4_100 = arith.constant 4 : index
      %c0_101 = arith.constant 0 : index
      %c0_102 = arith.constant 0 : index
      %165 = vector.load %arg14[%c4_100, %c0_101, %c0_102] : memref<5x1x32xf32, #tpu.memory_space<vmem>>, vector<1x1x32xf32>
      %166 = vector.shape_cast %165 : vector<1x1x32xf32> to vector<1x32xf32>
      %167 = vector.broadcast %166 : vector<1x32xf32> to vector<8x32xf32>
      %168 = arith.addf %164, %167 : vector<8x32xf32>
      %169 = vector.shape_cast %168 : vector<8x32xf32> to vector<1x8x32xf32>
      %170 = math.absf %169 : vector<1x8x32xf32>
      %171 = arith.mulf %170, %170 : vector<1x8x32xf32>
      %172 = arith.mulf %171, %170 : vector<1x8x32xf32>
      %cst_103 = arith.constant dense<0.000000e+00> : vector<1x32xf32>
      %173 = vector.multi_reduction <add>, %172, %cst_103 [1] : vector<1x8x32xf32> to vector<1x32xf32>
      %174 = vector.shape_cast %173 : vector<1x32xf32> to vector<1x1x32xf32>
      %cst_104 = arith.constant 0.333333343 : f32
      %175 = vector.broadcast %cst_104 : f32 to vector<1x1x32xf32>
      %176 = math.powf %174, %175 : vector<1x1x32xf32>
      %cst_105 = arith.constant 9.99999996E-13 : f32
      %177 = vector.broadcast %cst_105 : f32 to vector<1x1x32xf32>
      %178 = arith.maximumf %176, %177 : vector<1x1x32xf32>
      %cst_106 = arith.constant 1.000000e+00 : f32
      %179 = vector.broadcast %cst_106 : f32 to vector<1x1x32xf32>
      %180 = arith.divf %179, %178 : vector<1x1x32xf32>
      %181 = vector.broadcast %180 : vector<1x1x32xf32> to vector<1x8x32xf32>
      %182 = arith.mulf %169, %181 : vector<1x8x32xf32>
      %183 = arith.mulf %91, %91 : vector<1x8x32xf32>
      %cst_107 = arith.constant dense<0.000000e+00> : vector<1x8xf32>
      %184 = vector.multi_reduction <add>, %183, %cst_107 [2] : vector<1x8x32xf32> to vector<1x8xf32>
      %185 = vector.shape_cast %184 : vector<1x8xf32> to vector<1x8x1xf32>
      %186 = arith.mulf %91, %114 : vector<1x8x32xf32>
      %cst_108 = arith.constant dense<0.000000e+00> : vector<1x8xf32>
      %187 = vector.multi_reduction <add>, %186, %cst_108 [2] : vector<1x8x32xf32> to vector<1x8xf32>
      %188 = vector.shape_cast %187 : vector<1x8xf32> to vector<1x8x1xf32>
      %189 = arith.mulf %114, %114 : vector<1x8x32xf32>
      %cst_109 = arith.constant dense<0.000000e+00> : vector<1x8xf32>
      %190 = vector.multi_reduction <add>, %189, %cst_109 [2] : vector<1x8x32xf32> to vector<1x8xf32>
      %191 = vector.shape_cast %190 : vector<1x8xf32> to vector<1x8x1xf32>
      %192 = arith.mulf %191, %185 : vector<1x8x1xf32>
      %193 = math.rsqrt %192 : vector<1x8x1xf32>
      %194 = arith.mulf %188, %193 : vector<1x8x1xf32>
      %195 = arith.mulf %91, %137 : vector<1x8x32xf32>
      %cst_110 = arith.constant dense<0.000000e+00> : vector<1x8xf32>
      %196 = vector.multi_reduction <add>, %195, %cst_110 [2] : vector<1x8x32xf32> to vector<1x8xf32>
      %197 = vector.shape_cast %196 : vector<1x8xf32> to vector<1x8x1xf32>
      %198 = arith.mulf %137, %137 : vector<1x8x32xf32>
      %cst_111 = arith.constant dense<0.000000e+00> : vector<1x8xf32>
      %199 = vector.multi_reduction <add>, %198, %cst_111 [2] : vector<1x8x32xf32> to vector<1x8xf32>
      %200 = vector.shape_cast %199 : vector<1x8xf32> to vector<1x8x1xf32>
      %201 = arith.mulf %200, %185 : vector<1x8x1xf32>
      %202 = math.rsqrt %201 : vector<1x8x1xf32>
      %203 = arith.mulf %197, %202 : vector<1x8x1xf32>
      %204 = arith.mulf %91, %160 : vector<1x8x32xf32>
      %cst_112 = arith.constant dense<0.000000e+00> : vector<1x8xf32>
      %205 = vector.multi_reduction <add>, %204, %cst_112 [2] : vector<1x8x32xf32> to vector<1x8xf32>
      %206 = vector.shape_cast %205 : vector<1x8xf32> to vector<1x8x1xf32>
      %207 = arith.mulf %160, %160 : vector<1x8x32xf32>
      %cst_113 = arith.constant dense<0.000000e+00> : vector<1x8xf32>
      %208 = vector.multi_reduction <add>, %207, %cst_113 [2] : vector<1x8x32xf32> to vector<1x8xf32>
      %209 = vector.shape_cast %208 : vector<1x8xf32> to vector<1x8x1xf32>
      %210 = arith.mulf %209, %185 : vector<1x8x1xf32>
      %211 = math.rsqrt %210 : vector<1x8x1xf32>
      %212 = arith.mulf %206, %211 : vector<1x8x1xf32>
      %213 = arith.mulf %91, %182 : vector<1x8x32xf32>
      %cst_114 = arith.constant dense<0.000000e+00> : vector<1x8xf32>
      %214 = vector.multi_reduction <add>, %213, %cst_114 [2] : vector<1x8x32xf32> to vector<1x8xf32>
      %215 = vector.shape_cast %214 : vector<1x8xf32> to vector<1x8x1xf32>
      %216 = arith.mulf %182, %182 : vector<1x8x32xf32>
      %cst_115 = arith.constant dense<0.000000e+00> : vector<1x8xf32>
      %217 = vector.multi_reduction <add>, %216, %cst_115 [2] : vector<1x8x32xf32> to vector<1x8xf32>
      %218 = vector.shape_cast %217 : vector<1x8xf32> to vector<1x8x1xf32>
      %219 = arith.mulf %218, %185 : vector<1x8x1xf32>
      %220 = math.rsqrt %219 : vector<1x8x1xf32>
      %221 = arith.mulf %215, %220 : vector<1x8x1xf32>
      %222 = tpu.concatenate %194, %203, %212, %221 in 2 : vector<1x8x1xf32>, vector<1x8x1xf32>, vector<1x8x1xf32>, vector<1x8x1xf32> -> vector<1x8x4xf32>
      %cst_116 = arith.constant 0.00999999977 : f32
      %223 = vector.broadcast %cst_116 : f32 to vector<1x8x4xf32>
      %224 = arith.mulf %222, %223 : vector<1x8x4xf32>
      %cst_117 = arith.constant dense<0xFF800000> : vector<1x8xf32>
      %225 = vector.multi_reduction <maximumf>, %224, %cst_117 [2] : vector<1x8x4xf32> to vector<1x8xf32>
      %226 = vector.shape_cast %225 : vector<1x8xf32> to vector<1x8x1xf32>
      %227 = vector.broadcast %226 : vector<1x8x1xf32> to vector<1x8x4xf32>
      %228 = arith.subf %224, %227 : vector<1x8x4xf32>
      %229 = math.exp %228 : vector<1x8x4xf32>
      %cst_118 = arith.constant dense<0.000000e+00> : vector<1x8xf32>
      %230 = vector.multi_reduction <add>, %229, %cst_118 [2] : vector<1x8x4xf32> to vector<1x8xf32>
      %231 = vector.shape_cast %230 : vector<1x8xf32> to vector<1x8x1xf32>
      %232 = math.log %231 : vector<1x8x1xf32>
      %233 = vector.broadcast %226 : vector<1x8x1xf32> to vector<1x8x4xf32>
      %234 = arith.subf %224, %233 : vector<1x8x4xf32>
      %235 = vector.broadcast %232 : vector<1x8x1xf32> to vector<1x8x4xf32>
      %236 = arith.subf %234, %235 : vector<1x8x4xf32>
      %cst_119 = arith.constant 0.000000e+00 : f32
      %237 = vector.broadcast %cst_119 : f32 to vector<1x8x124xf32>
      %238 = tpu.concatenate %236, %237 in 2 : vector<1x8x4xf32>, vector<1x8x124xf32> -> vector<1x8x128xf32>
      %c0_120 = arith.constant 0 : index
      %c0_121 = arith.constant 0 : index
      %c0_122 = arith.constant 0 : index
      %239 = vector.load %arg16[%c0_120, %c0_121, %c0_122] : memref<1x8x128xf32, #tpu.memory_space<vmem>>, vector<1x8x128xf32>
      tpu.vector_store %arg16[%c0_120, %c0_121, %c0_122], %238 {strides = array<i32>} : memref<1x8x128xf32, #tpu.memory_space<vmem>>, vector<1x8x128xf32>,
      %cst_123 = arith.constant 0xFF800000 : f32
      %240 = vector.broadcast %cst_123 : f32 to vector<8x1xf32>
      %cst_124 = arith.constant 0.000000e+00 : f32
      %241 = vector.broadcast %cst_124 : f32 to vector<8x1xf32>
      %c0_125 = arith.constant 0 : index
      %c0_126 = arith.constant 0 : index
      %242 = vector.load %arg20[%c0_125, %c0_126] : memref<8x1xf32, #tpu.memory_space<vmem>>, vector<8x1xf32>
      tpu.vector_store %arg20[%c0_125, %c0_126], %240 {strides = array<i32>} : memref<8x1xf32, #tpu.memory_space<vmem>>, vector<8x1xf32>,
      %c0_127 = arith.constant 0 : index
      %c0_128 = arith.constant 0 : index
      %243 = vector.load %arg22[%c0_127, %c0_128] : memref<8x1xf32, #tpu.memory_space<vmem>>, vector<8x1xf32>
      tpu.vector_store %arg22[%c0_127, %c0_128], %240 {strides = array<i32>} : memref<8x1xf32, #tpu.memory_space<vmem>>, vector<8x1xf32>,
      %c0_129 = arith.constant 0 : index
      %c0_130 = arith.constant 0 : index
      %244 = vector.load %arg21[%c0_129, %c0_130] : memref<8x1xf32, #tpu.memory_space<vmem>>, vector<8x1xf32>
      tpu.vector_store %arg21[%c0_129, %c0_130], %241 {strides = array<i32>} : memref<8x1xf32, #tpu.memory_space<vmem>>, vector<8x1xf32>,
      %c0_131 = arith.constant 0 : index
      %c0_132 = arith.constant 0 : index
      %245 = vector.load %arg23[%c0_131, %c0_132] : memref<8x1xf32, #tpu.memory_space<vmem>>, vector<8x1xf32>
      tpu.vector_store %arg23[%c0_131, %c0_132], %241 {strides = array<i32>} : memref<8x1xf32, #tpu.memory_space<vmem>>, vector<8x1xf32>,
    } else {
    }
    %c0_4 = arith.constant 0 : index
    %c0_5 = arith.constant 0 : index
    %7 = vector.load %arg9[%c0_4, %c0_5] : memref<32x128xbf16, #tpu.memory_space<vmem>>, vector<32x128xbf16>
    %cst = arith.constant dense<0.000000e+00> : vector<8x128xf32>
    %8 = tpu.matmul %1, %7, %cst {dimension_numbers = #tpu.dot_dimension_numbers<[1], [0], [0], [1], [0, 0, 1, 1], [], []>} : vector<8x32xbf16>, vector<32x128xbf16>, vector<8x128xf32> -> vector<8x128xf32>
    %c0_6 = arith.constant 0 : index
    %c0_7 = arith.constant 0 : index
    %9 = vector.load %arg10[%c0_6, %c0_7] : memref<1x128xf32, #tpu.memory_space<vmem>>, vector<1x128xf32>
    %10 = vector.broadcast %9 : vector<1x128xf32> to vector<8x128xf32>
    %11 = arith.addf %8, %10 : vector<8x128xf32>
    %12 = tpu.iota {dimensions = array<i32: 2>} : vector<1x8x128xi32>
    %c128_i32 = arith.constant 128 : i32
    %13 = arith.muli %arg2, %c128_i32 : i32
    %14 = vector.broadcast %13 : i32 to vector<1x8x128xi32>
    %15 = arith.addi %12, %14 : vector<1x8x128xi32>
    %c0_8 = arith.constant 0 : index
    %c0_9 = arith.constant 0 : index
    %c0_10 = arith.constant 0 : index
    %16 = vector.load %arg3[%c0_8, %c0_9, %c0_10] : memref<1x8x1xi32, #tpu.memory_space<vmem>>, vector<1x8x1xi32>
    %17 = vector.broadcast %16 : vector<1x8x1xi32> to vector<1x8x128xi32>
    %18 = arith.cmpi eq, %17, %15 : vector<1x8x128xi32>
    %cst_11 = arith.constant 1.000000e+00 : f32
    %cst_12 = arith.constant 0.000000e+00 : f32
    %19 = vector.broadcast %cst_11 : f32 to vector<1x8x128xf32>
    %20 = vector.broadcast %cst_12 : f32 to vector<1x8x128xf32>
    %21 = arith.select %18, %19, %20 : vector<1x8x128xi1>, vector<1x8x128xf32>
    %22 = arith.truncf %21 : vector<1x8x128xf32> to vector<1x8x128xbf16>
    %c0_13 = arith.constant 0 : index
    %c0_14 = arith.constant 0 : index
    %c0_15 = arith.constant 0 : index
    %23 = vector.load %arg18[%c0_13, %c0_14, %c0_15] : memref<1x8x8xbf16, #tpu.memory_space<vmem>>, vector<1x8x8xbf16>
    "tpu.trace_start"() <{level = 10 : i32, message = "bts,bsv->btv"}> : () -> ()
    %cst_16 = arith.constant dense<0.000000e+00> : vector<1x8x128xf32>
    %24 = tpu.matmul %23, %22, %cst_16 {dimension_numbers = #tpu.dot_dimension_numbers<[2], [1], [1], [2], [0, 0, 0, 1, 1, 2], [0], [0]>} : vector<1x8x8xbf16>, vector<1x8x128xbf16>, vector<1x8x128xf32> -> vector<1x8x128xf32>
    "tpu.trace_stop"() : () -> ()
    %25 = vector.shape_cast %24 : vector<1x8x128xf32> to vector<8x128xf32>
    %c0_i32_17 = arith.constant 0 : i32
    %26 = arith.cmpi eq, %arg1, %c0_i32_17 : i32
    %27 = arith.extui %26 : i1 to i32
    %c0_i32_18 = arith.constant 0 : i32
    %28 = arith.cmpi ne, %27, %c0_i32_18 : i32
    scf.if %28 {
      %c0_20 = arith.constant 0 : index
      %c0_21 = arith.constant 0 : index
      %32 = vector.load %arg20[%c0_20, %c0_21] : memref<8x1xf32, #tpu.memory_space<vmem>>, vector<8x1xf32>
      %cst_22 = arith.constant dense<0xFF800000> : vector<8xf32>
      %33 = vector.multi_reduction <maximumf>, %11, %cst_22 [1] : vector<8x128xf32> to vector<8xf32>
      %34 = vector.shape_cast %33 : vector<8xf32> to vector<8x1xf32>
      %35 = arith.maximumf %32, %34 : vector<8x1xf32>
      %c0_23 = arith.constant 0 : index
      %c0_24 = arith.constant 0 : index
      %36 = vector.load %arg21[%c0_23, %c0_24] : memref<8x1xf32, #tpu.memory_space<vmem>>, vector<8x1xf32>
      %c0_25 = arith.constant 0 : index
      %c0_26 = arith.constant 0 : index
      %37 = vector.load %arg20[%c0_25, %c0_26] : memref<8x1xf32, #tpu.memory_space<vmem>>, vector<8x1xf32>
      %38 = arith.subf %37, %35 : vector<8x1xf32>
      %39 = math.exp %38 : vector<8x1xf32>
      %40 = arith.mulf %36, %39 : vector<8x1xf32>
      %41 = vector.broadcast %35 : vector<8x1xf32> to vector<8x128xf32>
      %42 = arith.subf %11, %41 : vector<8x128xf32>
      %43 = math.exp %42 : vector<8x128xf32>
      %cst_27 = arith.constant dense<0.000000e+00> : vector<8xf32>
      %44 = vector.multi_reduction <add>, %43, %cst_27 [1] : vector<8x128xf32> to vector<8xf32>
      %45 = vector.shape_cast %44 : vector<8xf32> to vector<8x1xf32>
      %46 = arith.addf %40, %45 : vector<8x1xf32>
      %c0_28 = arith.constant 0 : index
      %c0_29 = arith.constant 0 : index
      %47 = vector.load %arg21[%c0_28, %c0_29] : memref<8x1xf32, #tpu.memory_space<vmem>>, vector<8x1xf32>
      tpu.vector_store %arg21[%c0_28, %c0_29], %46 {strides = array<i32>} : memref<8x1xf32, #tpu.memory_space<vmem>>, vector<8x1xf32>,
      %c0_30 = arith.constant 0 : index
      %c0_31 = arith.constant 0 : index
      %48 = vector.load %arg20[%c0_30, %c0_31] : memref<8x1xf32, #tpu.memory_space<vmem>>, vector<8x1xf32>
      tpu.vector_store %arg20[%c0_30, %c0_31], %35 {strides = array<i32>} : memref<8x1xf32, #tpu.memory_space<vmem>>, vector<8x1xf32>,
      %c0_32 = arith.constant 0 : index
      %c0_33 = arith.constant 0 : index
      %49 = vector.load %arg22[%c0_32, %c0_33] : memref<8x1xf32, #tpu.memory_space<vmem>>, vector<8x1xf32>
      %cst_34 = arith.constant dense<0xFF800000> : vector<8xf32>
      %50 = vector.multi_reduction <maximumf>, %25, %cst_34 [1] : vector<8x128xf32> to vector<8xf32>
      %51 = vector.shape_cast %50 : vector<8xf32> to vector<8x1xf32>
      %52 = arith.maximumf %49, %51 : vector<8x1xf32>
      %c0_35 = arith.constant 0 : index
      %c0_36 = arith.constant 0 : index
      %53 = vector.load %arg23[%c0_35, %c0_36] : memref<8x1xf32, #tpu.memory_space<vmem>>, vector<8x1xf32>
      %c0_37 = arith.constant 0 : index
      %c0_38 = arith.constant 0 : index
      %54 = vector.load %arg22[%c0_37, %c0_38] : memref<8x1xf32, #tpu.memory_space<vmem>>, vector<8x1xf32>
      %55 = arith.subf %54, %52 : vector<8x1xf32>
      %56 = math.exp %55 : vector<8x1xf32>
      %57 = arith.mulf %53, %56 : vector<8x1xf32>
      %58 = vector.broadcast %52 : vector<8x1xf32> to vector<8x128xf32>
      %59 = arith.subf %25, %58 : vector<8x128xf32>
      %60 = math.exp %59 : vector<8x128xf32>
      %cst_39 = arith.constant dense<0.000000e+00> : vector<8xf32>
      %61 = vector.multi_reduction <add>, %60, %cst_39 [1] : vector<8x128xf32> to vector<8xf32>
      %62 = vector.shape_cast %61 : vector<8xf32> to vector<8x1xf32>
      %63 = arith.addf %57, %62 : vector<8x1xf32>
      %c0_40 = arith.constant 0 : index
      %c0_41 = arith.constant 0 : index
      %64 = vector.load %arg23[%c0_40, %c0_41] : memref<8x1xf32, #tpu.memory_space<vmem>>, vector<8x1xf32>
      tpu.vector_store %arg23[%c0_40, %c0_41], %63 {strides = array<i32>} : memref<8x1xf32, #tpu.memory_space<vmem>>, vector<8x1xf32>,
      %c0_42 = arith.constant 0 : index
      %c0_43 = arith.constant 0 : index
      %65 = vector.load %arg22[%c0_42, %c0_43] : memref<8x1xf32, #tpu.memory_space<vmem>>, vector<8x1xf32>
      tpu.vector_store %arg22[%c0_42, %c0_43], %52 {strides = array<i32>} : memref<8x1xf32, #tpu.memory_space<vmem>>, vector<8x1xf32>,
    } else {
    }
    %c1_i32 = arith.constant 1 : i32
    %29 = arith.cmpi eq, %arg1, %c1_i32 : i32
    %30 = arith.extui %29 : i1 to i32
    %c0_i32_19 = arith.constant 0 : i32
    %31 = arith.cmpi ne, %30, %c0_i32_19 : i32
    scf.if %31 {
      %c0_20 = arith.constant 0 : index
      %c0_21 = arith.constant 0 : index
      %32 = vector.load %arg19[%c0_20, %c0_21] : memref<8x1xf32, #tpu.memory_space<vmem>>, vector<8x1xf32>
      %c0_22 = arith.constant 0 : index
      %c0_23 = arith.constant 0 : index
      %33 = vector.load %arg20[%c0_22, %c0_23] : memref<8x1xf32, #tpu.memory_space<vmem>>, vector<8x1xf32>
      %c0_24 = arith.constant 0 : index
      %c0_25 = arith.constant 0 : index
      %34 = vector.load %arg21[%c0_24, %c0_25] : memref<8x1xf32, #tpu.memory_space<vmem>>, vector<8x1xf32>
      %35 = math.log %34 : vector<8x1xf32>
      %36 = arith.addf %33, %35 : vector<8x1xf32>
      %c0_26 = arith.constant 0 : index
      %c0_27 = arith.constant 0 : index
      %37 = vector.load %arg22[%c0_26, %c0_27] : memref<8x1xf32, #tpu.memory_space<vmem>>, vector<8x1xf32>
      %c0_28 = arith.constant 0 : index
      %c0_29 = arith.constant 0 : index
      %38 = vector.load %arg23[%c0_28, %c0_29] : memref<8x1xf32, #tpu.memory_space<vmem>>, vector<8x1xf32>
      %39 = math.log %38 : vector<8x1xf32>
      %40 = arith.addf %37, %39 : vector<8x1xf32>
      %41 = vector.broadcast %36 : vector<8x1xf32> to vector<8x128xf32>
      %42 = arith.subf %11, %41 : vector<8x128xf32>
      %43 = math.exp %42 : vector<8x128xf32>
      %44 = vector.broadcast %32 : vector<8x1xf32> to vector<8x128xf32>
      %45 = arith.mulf %44, %43 : vector<8x128xf32>
      %cst_30 = arith.constant 1.000000e+00 : f32
      %46 = vector.broadcast %cst_30 : f32 to vector<8x1xf32>
      %47 = arith.subf %46, %32 : vector<8x1xf32>
      %48 = vector.broadcast %40 : vector<8x1xf32> to vector<8x128xf32>
      %49 = arith.subf %25, %48 : vector<8x128xf32>
      %50 = math.exp %49 : vector<8x128xf32>
      %51 = vector.broadcast %47 : vector<8x1xf32> to vector<8x128xf32>
      %52 = arith.mulf %51, %50 : vector<8x128xf32>
      %53 = arith.addf %45, %52 : vector<8x128xf32>
      %54 = math.log %53 : vector<8x128xf32>
      %55 = vector.shape_cast %54 : vector<8x128xf32> to vector<1x8x128xf32>
      %c0_31 = arith.constant 0 : index
      %c0_32 = arith.constant 0 : index
      %c0_33 = arith.constant 0 : index
      %56 = vector.load %arg15[%c0_31, %c0_32, %c0_33] : memref<1x8x128xf32, #tpu.memory_space<vmem>>, vector<1x8x128xf32>
      tpu.vector_store %arg15[%c0_31, %c0_32, %c0_33], %55 {strides = array<i32>} : memref<1x8x128xf32, #tpu.memory_space<vmem>>, vector<1x8x128xf32>,
    } else {
    }
    return
  }
  func.func @transform_0(%arg0: i32, %arg1: i32, %arg2: i32) -> (i32, i32, i32) {
    %c0_i32 = arith.constant 0 : i32
    %c0_i32_0 = arith.constant 0 : i32
    %c0_i32_1 = arith.constant 0 : i32
    return %arg0, %c0_i32, %c0_i32_0 : i32, i32, i32
  }
  func.func @transform_1(%arg0: i32, %arg1: i32, %arg2: i32) -> (i32, i32, i32) {
    %c0_i32 = arith.constant 0 : i32
    %c0_i32_0 = arith.constant 0 : i32
    %c0_i32_1 = arith.constant 0 : i32
    return %arg0, %c0_i32, %c0_i32_0 : i32, i32, i32
  }
  func.func @transform_2(%arg0: i32, %arg1: i32, %arg2: i32) -> (i32, i32, i32) {
    %c0_i32 = arith.constant 0 : i32
    %c0_i32_0 = arith.constant 0 : i32
    %c0_i32_1 = arith.constant 0 : i32
    return %arg0, %c0_i32, %c0_i32_0 : i32, i32, i32
  }
  func.func @transform_3(%arg0: i32, %arg1: i32, %arg2: i32) -> (i32, i32, i32) {
    %c0_i32 = arith.constant 0 : i32
    %c0_i32_0 = arith.constant 0 : i32
    %c0_i32_1 = arith.constant 0 : i32
    return %arg0, %c0_i32, %c0_i32_0 : i32, i32, i32
  }
  func.func @transform_4(%arg0: i32, %arg1: i32, %arg2: i32) -> (i32, i32, i32) {
    %c0_i32 = arith.constant 0 : i32
    %c0_i32_0 = arith.constant 0 : i32
    %c0_i32_1 = arith.constant 0 : i32
    return %arg0, %c0_i32, %c0_i32_0 : i32, i32, i32
  }
  func.func @transform_5(%arg0: i32, %arg1: i32, %arg2: i32) -> (i32, i32, i32) {
    %c0_i32 = arith.constant 0 : i32
    %c0_i32_0 = arith.constant 0 : i32
    %c0_i32_1 = arith.constant 0 : i32
    return %arg0, %c0_i32, %c0_i32_0 : i32, i32, i32
  }
  func.func @transform_6(%arg0: i32, %arg1: i32, %arg2: i32) -> (i32, i32) {
    %c0_i32 = arith.constant 0 : i32
    %c0_i32_0 = arith.constant 0 : i32
    return %c0_i32, %arg2 : i32, i32
  }
  func.func @transform_7(%arg0: i32, %arg1: i32, %arg2: i32) -> (i32, i32) {
    %c0_i32 = arith.constant 0 : i32
    %c0_i32_0 = arith.constant 0 : i32
    return %c0_i32, %arg2 : i32, i32
  }
  func.func @transform_8(%arg0: i32, %arg1: i32, %arg2: i32) -> (i32, i32) {
    %c0_i32 = arith.constant 0 : i32
    %c0_i32_0 = arith.constant 0 : i32
    %c0_i32_1 = arith.constant 0 : i32
    return %c0_i32, %c0_i32_0 : i32, i32
  }
  func.func @transform_9(%arg0: i32, %arg1: i32, %arg2: i32) -> (i32, i32) {
    %c0_i32 = arith.constant 0 : i32
    %c0_i32_0 = arith.constant 0 : i32
    %c0_i32_1 = arith.constant 0 : i32
    return %c0_i32, %c0_i32_0 : i32, i32
  }
  func.func @transform_10(%arg0: i32, %arg1: i32, %arg2: i32) -> (i32, i32, i32) {
    %c0_i32 = arith.constant 0 : i32
    %c0_i32_0 = arith.constant 0 : i32
    %c0_i32_1 = arith.constant 0 : i32
    %c0_i32_2 = arith.constant 0 : i32
    return %c0_i32, %c0_i32_0, %c0_i32_1 : i32, i32, i32
  }
  func.func @transform_11(%arg0: i32, %arg1: i32, %arg2: i32) -> (i32, i32, i32) {
    %c0_i32 = arith.constant 0 : i32
    %c0_i32_0 = arith.constant 0 : i32
    %c0_i32_1 = arith.constant 0 : i32
    %c0_i32_2 = arith.constant 0 : i32
    return %c0_i32, %c0_i32_0, %c0_i32_1 : i32, i32, i32
  }
  func.func @transform_12(%arg0: i32, %arg1: i32, %arg2: i32) -> (i32, i32, i32) {
    %0 = arith.muli %arg1, %arg2 : i32
    %c0_i32 = arith.constant 0 : i32
    %c0_i32_0 = arith.constant 0 : i32
    return %arg0, %c0_i32, %0 : i32, i32, i32
  }
  func.func @transform_13(%arg0: i32, %arg1: i32, %arg2: i32) -> (i32, i32, i32) {
    %c0_i32 = arith.constant 0 : i32
    %c0_i32_0 = arith.constant 0 : i32
    %c0_i32_1 = arith.constant 0 : i32
    return %arg0, %c0_i32, %c0_i32_0 : i32, i32, i32
  }
  func.func @transform_14(%arg0: i32, %arg1: i32, %arg2: i32) -> (i32, i32, i32) {
    %c0_i32 = arith.constant 0 : i32
    %c0_i32_0 = arith.constant 0 : i32
    %c0_i32_1 = arith.constant 0 : i32
    return %arg0, %c0_i32, %c0_i32_0 : i32, i32, i32
  }
}

</mosaic_0001>

<bundles_post_ra>
// kernel: tpu_custom_call.1
= control target key start
LH: loop header
LB: loop body
LE: loop exit
PB: predicated region body
PF: predicated region fallthrough
CT: control target
= control target key end

     0   :  { %s3303_s0 = inlined_call_operand.vmem [shape: s32[2,8,1], index: 0, kind: input, shape index: {}]   ;;  %s3304_s1 = inlined_call_operand.vmem [shape: bf16[2,8,32], index: 1, kind: input, shape index: {}]   ;;  %s3305_s2 = inlined_call_operand.hbm [shape: bf16[2,8,32], index: 2, kind: input, shape index: {}]   ;;  %s3306_s3 = inlined_call_operand.hbm [shape: bf16[2,8,32], index: 3, kind: input, shape index: {}]   ;;  %s3307_s4 = inlined_call_operand.hbm [shape: bf16[2,8,32], index: 4, kind: input, shape index: {}]   ;;  %s3308_s5 = inlined_call_operand.hbm [shape: bf16[2,8,32], index: 5, kind: input, shape index: {}]   ;;  %s3309_s6 = inlined_call_operand.vmem [shape: bf16[32,128], index: 6, kind: input, shape index: {}]   ;;  %s3310_s7 = inlined_call_operand.vmem [shape: f32[1,128], index: 7, kind: input, shape index: {}]   ;;  %s3311_s8 = inlined_call_operand.vmem [shape: f32[1,32], index: 8, kind: input, shape index: {}]   ;;  %s3312_s9 = inlined_call_operand.<no memory space> [shape: f32[1,1], index: 9, kind: input, shape index: {}]   ;;  %s3313_s10 = inlined_call_operand.hbm [shape: bf16[5,32,32], index: 10, kind: input, shape index: {}]   ;;  %s3314_s11 = inlined_call_operand.vmem [shape: f32[5,1,32], index: 11, kind: input, shape index: {}]   ;;  %s3315_s12 = inlined_call_operand.hbm [shape: f32[2,8,128], index: 12, kind: output, shape index: {0}]   ;;  %s3316_s13 = inlined_call_operand.hbm [shape: f32[2,8,128], index: 13, kind: output, shape index: {1}]   ;;  %s3317_s14 = inlined_call_operand.hbm [shape: f32[2,8,128], index: 14, kind: output, shape index: {2}]  }
   0x1   :  { %3333 = sst [smem:[#allocation36_spill]] %s3303_s0 }
   0x2   :  { %3334 = sst [smem:[#allocation37_spill]] %s3306_s3 }
   0x3   :  { %3335 = sst [smem:[#allocation38_spill]] %s3309_s6 }
   0x4   :  { %3336 = sst [smem:[#allocation39_spill]] %s3310_s7 }
   0x5   :  { %3337 = sst [smem:[#allocation40_spill]] %s3311_s8 }
   0x6   :  { %3338 = sst [smem:[#allocation41_spill]] %s3313_s10 }
   0x7   :  { %3339 = sst [smem:[#allocation42_spill]] %s3315_s12 }
   0x8   :  { %3340 = sst [smem:[#allocation43_spill]] %s3316_s13 }
   0x9   :  { %3341 = sst [smem:[#allocation44_spill]] %s3317_s14 }
   0xa   :  { %20 = sst [smem:[#allocation8]] %s3312_s9 }
   0xb   :  { %21 = vsyncpa [#allocation10], 0 }
   0xc   :  { %23 = vsyncpa [#allocation10 + $0x1], 0 }
   0xd   :  { %24 = vsyncpa [#allocation13], 0 }
   0xe   :  { %26 = vsyncpa [#allocation13 + $0x1], 0 }
   0xf   :  { %27 = vsyncpa [#allocation16], 0 }
  0x10   :  { %29 = vsyncpa [#allocation16 + $0x1], 0 }
  0x11   :  { %30 = vsyncpa [#allocation11], 0 }
  0x12   :  { %32 = vsyncpa [#allocation11 + $0x1], 0 }
  0x13   :  { %33 = vsyncpa [#allocation20], 0 }
  0x14   :  { %35 = vsyncpa [#allocation20 + $0x1], 0  ;;  %s2797_s15 = smov 0   ;;  %s2799_s16 = smov 0  }
  0x15   :  { %s2801_s17 = smov 0   ;;  %s2803_s18 = smov 0  }
  0x16   :  { %s2805_s19 = smov 0   ;;  %s2807_s9 = smov 0  }
  0x17   :  { %s2809_s20 = smov 0   ;;  %s2811_s21 = smov 0  }
  0x18 LB: > { %3342 = sst [smem:[#allocation28_spill]] %s2671_s15  ;;  %s2838_s22 = sadd.s32 4294967295, %s2699_s21   ;;  %s2699_s21 = sphi %s2811_s21, %s41_s21   ;;  %s2695_s20 = sphi %s2809_s20, %s3378_s20   ;;  %s2691_s9 = sphi %s2807_s9, %s3377_s9   ;;  %s2687_s19 = sphi %s2805_s19, %s3376_s19   ;;  %s2683_s18 = sphi %s2803_s18, %s3375_s18   ;;  %s2679_s17 = sphi %s2801_s17, %s3381_s17   ;;  %s2675_s16 = sphi %s2799_s16, %s3380_s16   ;;  %s2671_s15 = sphi %s2797_s15, %s3379_s15  }
  0x19   : > { %3343 = sst [smem:[#allocation29_spill]] %s2691_s9  ;;  %s3318_s23 = sadd.s32 4294967294, %s2699_s21  }
  0x1a   : > { %3344 = sst [smem:[#allocation30_spill]] %s2695_s20  ;;  %p132_p0 = scmp.ne.s32.totalorder %s2675_s16, %s2671_s15 }
  0x1b   : > { %p133_p1 = scmp.eq.s32.totalorder %s2838_s22, 0  ;;  %p380_p3 = scmp.eq.s32.totalorder %s3318_s23, 3 }
  0x1c   : > { %p1931_p5 = scmp.ge.s32.totalorder %s2699_s21, 1  ;;  %p439_p7 = scmp.lt.s32.totalorder %s2699_s21, 5 }
  0x1d   : > { %p2849_p4 = por %p133_p1, %p132_p0  ;;  %p2854_p6 = por %p380_p3, %p132_p0 }
  0x1e   : > { %p2859_p8 = pnand %p1931_p5, %p439_p7  ;;  %s2701_s27 = smov [#allocation17]  }
  0x1f   : > { %s3346_s25 = scalar_select %p2854_p6, 1, 0 }
  0x20   : > { %s470_s28 = sshll.u32 %s2701_s27, 4  ;;  %p2206_p9 = pneg %p2859_p8  ;;  %s471_s28 = int_to_ptr.vmem [resolvable:$true] %s470_s28 }
  0x21   : > { %3347 = sst [smem:[#allocation31_spill]] %s3346_s25  ;;  %s2408_s29 = scalar_lea.vmem %s471_s28, 1280 }
  0x22   : > { %p2207_p10 = pnand %p2206_p9, %p133_p1  ;;  %p2409_p12 = scmp.ne.s32.totalorder %s471_s28, %s2408_s29 }
  0x23   : > { %p2416_p3 = scmp.lt.s32.totalorder %s471_s28, %s471_s28  ;;  %p2417_p2 = scmp.lt.s32.totalorder %s2408_s29, %s2408_s29 }
  0x24   : > { %p2399_p11 = pneg %p2207_p10 }
  0x25   : > { %p2418_p6 = por %p2417_p2, %p2416_p3 }
  0x26   : > { %p2411_p13 = pnand %p2409_p12, %p2399_p11 }
  0x28   : > { %p2412_p0 = pneg %p2411_p13 }
  0x2a   : > { %p2419_p5 = pnand %p2418_p6, %p2412_p0 }
  0x2c   : > { %2422 = shalt.err (!%p2419_p5)
}
  0x2d   : > { %s2702_s30 = smov 64   ;;  %s2703_s27 = smov 4  }
  0x2e   : > { %s3349_s10 = sld [smem:[#allocation41_spill]]  ;;  %s56_s29 = sadd.s32 1, %s2691_s9 }
  0x2f   : > { %p58_p2 = scmp.ge.s32.totalorder %s56_s29, 2  ;;  %s60_s15 = sadd.s32 1, %s2695_s20 }
  0x30   : > { %s119_s14 = sadd.s32 1, %s2679_s17  ;;  %p126_p6 = scmp.ne.s32.totalorder %s2679_s17, %s2675_s16 }
  0x31   : > { %s3383_s29 = smov (%p58_p2, %s56_s29), 0  ;;  %s3385_s15 = smov (!%p58_p2, %s60_s15), %s2695_s20 }
  0x32   : > { %3350 = sst [smem:[#allocation32_spill]] %s3383_s29  ;;  %p127_p7 = scmp.eq.s32.totalorder %s2699_s21, 0 }
  0x33   : > { %p3351_p9 = scmp.eq.s32.totalorder %s2838_s22, 3  ;;  %p62_p12 = scmp.ge.s32.totalorder %s3385_s15, 2 }
  0x34   : > { %2209 = dma.hbm_to_vmem [thread:$0]  (!%p2207_p10), %s3349_s10, 1280, %s471_s28, [#allocation16], %s2702_s30, %s2702_s30, %s2703_s27  }
  0x35   : > { %p2881_p11 = por %p3351_p9, %p126_p6  ;;  %p2234_p10 = scmp.lt.s32.totalorder %s2699_s21, 4 }
  0x36   : > { %p128_p13 = por %p127_p7, %p126_p6  ;;  %s3325_s23 = sand.u32 1, %s2679_s17  }
  0x37   : > { %s3352_s12 = scalar_select %p2881_p11, 1, 0 }
  0x38   : > { %s3387_s15 = smov (%p62_p12, %s3385_s15), 0  ;;  %s2891_s25 = sshll.u32 %s3325_s23, 2 }
  0x39   : > { %3353 = sst [smem:[#allocation33_spill]] %s3352_s12  ;;  %s2894_s28 = sshll.u32 %s2695_s20, 6 }
  0x3a   : > { %3354 = sst [smem:[#allocation34_spill]] %s3387_s15  ;;  %s116_s30 = ssub.s32 %s2695_s20, %s3387_s15 }
  0x3b   : > { %p2898_p0 = pnand %p2234_p10, %p128_p13  ;;  %p117_p3 = scmp.eq.s32.totalorder %s116_s30, 0 }
  0x3c   : > { %s3331_s10 = sand.u32 1, %s2699_s21   ;;  %s3357_s3 = sld [smem:[#allocation37_spill]] }
  0x3d   : > { %s2904_s29 = scalar_select %p117_p3, %s2679_s17, %s119_s14  }
  0x3e   : > { %s523_s12 = scalar_lea.vmem [#allocation12], %s2891_s25  ;;  %s2913_s6 = scalar_lea.sflag [#allocation13], %s3331_s10 }
  0x3f   : > { %3356 = sst [smem:[#allocation35_spill]] %s2904_s29  ;;  %s530_s7 = sshll.u32 %s523_s12, 4  ;;  %s531_s7 = int_to_ptr.vmem [resolvable:$true] %s530_s7 }
  0x40   : > { %p2425_p5 = pneg %p2898_p0  ;;  %s2436_s15 = scalar_lea.vmem %s531_s7, 64 }
  0x41   : > { %p2437_p2 = scmp.ne.s32.totalorder %s531_s7, %s2436_s15  ;;  %s2704_s14 = smov [#allocation12]  }
  0x42   : > { %s528_s23 = scalar_lea.hbm %s3357_s3, %s2894_s28  ;;  %s2441_s30 = sshll.u32 %s2704_s14, 4  ;;  %s2442_s30 = int_to_ptr.vmem [resolvable:$false] %s2441_s30 }
  0x43   : > { %p2439_p6 = pnand %p2437_p2, %p2425_p5  ;;  %s2443_s20 = scalar_lea.vmem %s2442_s30, 128 }
  0x44   : > { %p2444_p9 = scmp.lt.s32.totalorder %s531_s7, %s2442_s30  ;;  %p2445_p12 = scmp.lt.s32.totalorder %s2443_s20, %s2436_s15 }
  0x45   : > { %p2440_p7 = pneg %p2439_p6 }
  0x46   : > { %p2446_p10 = por %p2445_p12, %p2444_p9 }
  0x48   : > { %p2447_p13 = pnand %p2446_p10, %p2440_p7 }
  0x4a   : > { %2450 = shalt.err (!%p2447_p13)
}
  0x4b   : > { %2216 = dma.hbm_to_vmem [thread:$0]  (!%p2898_p0), %s528_s23, 64, %s531_s7, %s2913_s6  }
  0x4c   : > { %s510_s9 = scalar_lea.hbm %s3305_s2, %s2894_s28  ;;  %s505_s14 = scalar_lea.vmem [#allocation9], %s2891_s25 }
  0x4d   : > { %s512_s10 = sshll.u32 %s505_s14, 4  ;;  %s546_s30 = scalar_lea.hbm %s3307_s4, %s2894_s28  ;;  %s513_s10 = int_to_ptr.vmem [resolvable:$true] %s512_s10 }
  0x4e   : > { %s3358_s3 = sand.u32 1, %s2679_s17   ;;  %s2464_s8 = scalar_lea.vmem %s513_s10, 64 }
  0x4f   : > { %s502_s29 = scalar_lea.sflag [#allocation10], %s3358_s3  ;;  %p2465_p3 = scmp.ne.s32.totalorder %s513_s10, %s2464_s8 }
  0x50   : > { %s2705_s7 = smov [#allocation9]  }
  0x51   : > { %p2467_p2 = pnand %p2465_p3, %p2425_p5  ;;  %s2469_s23 = sshll.u32 %s2705_s7, 4  ;;  %s2470_s23 = int_to_ptr.vmem [resolvable:$false] %s2469_s23 }
  0x52   : > { %s2471_s12 = scalar_lea.vmem %s2470_s23, 128  ;;  %p2472_p7 = scmp.lt.s32.totalorder %s513_s10, %s2470_s23 }
  0x53   : > { %p2468_p6 = pneg %p2467_p2  ;;  %p2473_p9 = scmp.lt.s32.totalorder %s2471_s12, %s2464_s8 }
  0x55   : > { %p2474_p12 = por %p2473_p9, %p2472_p7 }
  0x57   : > { %p2475_p10 = pnand %p2474_p12, %p2468_p6 }
  0x59   : > { %2478 = shalt.err (!%p2475_p10)
}
  0x5a   : > { %2213 = dma.hbm_to_vmem [thread:$0]  (!%p2898_p0), %s510_s9, 64, %s513_s10, %s502_s29  }
  0x5b   : > { %s541_s3 = scalar_lea.vmem [#allocation14], %s2891_s25  ;;  %s564_s20 = scalar_lea.hbm %s3308_s5, %s2894_s28 }
  0x5c   : > { %s548_s13 = sshll.u32 %s541_s3, 4  ;;  %s2706_s8 = smov [#allocation14]   ;;  %s549_s13 = int_to_ptr.vmem [resolvable:$true] %s548_s13 }
  0x5d   : > { %s2492_s7 = scalar_lea.vmem %s549_s13, 64  ;;  %s2497_s23 = sshll.u32 %s2706_s8, 4  ;;  %s2498_s23 = int_to_ptr.vmem [resolvable:$false] %s2497_s23 }
  0x5e   : > { %p2493_p13 = scmp.ne.s32.totalorder %s549_s13, %s2492_s7  ;;  %s2499_s12 = scalar_lea.vmem %s2498_s23, 128 }
  0x5f   : > { %p2500_p6 = scmp.lt.s32.totalorder %s549_s13, %s2498_s23  ;;  %p2501_p7 = scmp.lt.s32.totalorder %s2499_s12, %s2492_s7 }
  0x60   : > { %p2495_p3 = pnand %p2493_p13, %p2425_p5 }
  0x61   : > { %p2502_p9 = por %p2501_p7, %p2500_p6 }
  0x62   : > { %p2496_p2 = pneg %p2495_p3 }
  0x64   : > { %p2503_p12 = pnand %p2502_p9, %p2496_p2 }
  0x66   : > { %2506 = shalt.err (!%p2503_p12)
}
  0x67   : > { %2219 = dma.hbm_to_vmem [thread:$0]  (!%p2898_p0), %s546_s30, 64, %s549_s13, %s2913_s6  }
  0x68   : > { %s559_s9 = scalar_lea.vmem [#allocation15], %s2891_s25  ;;  %s3359_s14 = sand.u32 1, %s2699_s21  }
  0x69   : > { %s566_s3 = sshll.u32 %s559_s9, 4  ;;  %s556_s15 = scalar_lea.sflag [#allocation16], %s3359_s14  ;;  %s567_s3 = int_to_ptr.vmem [resolvable:$true] %s566_s3 }
  0x6a   : > { %s2520_s7 = scalar_lea.vmem %s567_s3, 64  ;;  %s2707_s8 = smov [#allocation15]  }
  0x6b   : > { %p2521_p10 = scmp.ne.s32.totalorder %s567_s3, %s2520_s7  ;;  %s2525_s23 = sshll.u32 %s2707_s8, 4  ;;  %s2526_s23 = int_to_ptr.vmem [resolvable:$false] %s2525_s23 }
  0x6c   : > { %s2527_s12 = scalar_lea.vmem %s2526_s23, 128  ;;  %p2528_p2 = scmp.lt.s32.totalorder %s567_s3, %s2526_s23 }
  0x6d   : > { %p2523_p13 = pnand %p2521_p10, %p2425_p5  ;;  %p2529_p6 = scmp.lt.s32.totalorder %s2527_s12, %s2520_s7 }
  0x6f   : > { %p2524_p3 = pneg %p2523_p13  ;;  %p2530_p7 = por %p2529_p6, %p2528_p2 }
  0x71   : > { %p2531_p9 = pnand %p2530_p7, %p2524_p3 }
  0x73   : > { %2534 = shalt.err (!%p2531_p9)
}
  0x74   : > { %2222 = dma.hbm_to_vmem [thread:$0]  (!%p2898_p0), %s564_s20, 64, %s567_s3, %s556_s15  }
  0x75   : > { %575 = sbr.rel (%p2859_p8) target bundleno = 2329 (0x919), region = 68  ;;  %s2971_s30 = sand.u32 (!%p2859_p8), 1, %s2675_s16  }
  0x76   : > { %s2974_s13 = sshll.u32 (!%p2859_p8), %s2971_s30, 2  ;;  %s578_s10 = scalar_lea.sflag (!%p2859_p8), [#allocation10], %s2971_s30 }
  0x77   : > { %s581_s27 = scalar_lea.vmem (!%p2859_p8), [#allocation9], %s2974_s13 }
  0x7a   : > { %2646 = dma.done.wait (%p2849_p4), %s578_s10, 64  }
  0x7b   : > { %2648 = vsyncadd (%p2849_p4), %s578_s10, 4294967232  ;;  %s2983_s26 = sand.u32 1, %s2838_s22   ;;  %s590_s20 = scalar_lea.vmem [#allocation12], %s2974_s13 }
  0x7c   : > { %s587_s28 = scalar_lea.sflag [#allocation13], %s2983_s26 }
  0x7d   : > { %2650 = dma.done.wait (%p2849_p4), %s587_s28, 128  }
  0x7e   : > { %2652 = vsyncadd (%p2849_p4), %s587_s28, 4294967168  ;;  %s599_s29 = scalar_lea.vmem [#allocation14], %s2974_s13  ;;  %s605_s9 = scalar_lea.sflag [#allocation16], %s2983_s26 }
  0x7f   : > { %s608_s3 = scalar_lea.vmem [#allocation15], %s2974_s13 }
  0x80   : > { %2654 = dma.done.wait (%p2849_p4), %s605_s9, 64  }
  0x81   : > { %2656 = vsyncadd (%p2849_p4), %s605_s9, 4294967232 }
  0x82   : > { %2658 = dma.done.wait (%p133_p1), [#allocation16], 1280  }
  0x83   : > { %2660 = vsyncadd (%p133_p1), [#allocation16], 4294966016  ;;  %p697_p8 = scmp.lt.s32.totalorder %s2687_s19, 1  ;;  %s3004_s14 = sshll.u32 %s2971_s30, 3 }
  0x84   : > { %p715_p0 = scmp.eq.s32.totalorder %s2683_s18, 0  ;;  %s3360_s0 = sld [smem:[#allocation36_spill]] }
  0x85   : > { %s698_s15 = scalar_select %p697_p8, %s2687_s19, 1  ;;  %v721_v1 = vld [vmem:[%s581_s27] sm:$0xf] (%p715_p0)  ;;  %vm722_vm0 = vcmask (%p715_p0), 261120   ;;  %v2708_v2 = vmov (%p715_p0), 0.0   ;;  %vm2709_vm1 = vmmov (%p715_p0), 0  }
  0x86   : > { %s682_s10 = scalar_lea.vmem [#allocation18], %s3004_s14  ;;  %s689_s28 = scalar_lea.vmem [#allocation19], %s3004_s14  ;;  %2026 = vmatprep.subr.bf16.mxu0 (%p715_p0), %v2708_v2  ;;  %v727_v3 = vsel (%p715_p0), %vm722_vm0, %v721_v1, 0  ;;  %2028 = vmatprep.mubr.msk.bf16.mxu0 (%p715_p0), %vm2709_vm1, %v2708_v2  ;;  %vm776_vm2 = vcmask (%p715_p0), 1043456   ;;  %v2312_v5 = vld [vmem:[#allocation17 + $0x8] sm:$0xff] (%p715_p0)   ;;  %v2313_v6 = vld [vmem:[#allocation17] sm:$0xff] (%p715_p0)  }
  0x87   : > { %s1953_s24 = sshll.u32 %s698_s15, 3  ;;  %s1954_s7 = sshll.u32 %s698_s15, 2  ;;  %2027 = vmatpush3.bf16.xpose.msra.mxu0 (%p715_p0), %v727_v3  ;;  %2032 = vmatprep.subr.bf16.mxu1 (%p715_p0), %v2708_v2  ;;  %v777_v4 = vsel (%p715_p0), %vm776_vm2, %v721_v1, 0  ;;  %v2314_v7 = vld [vmem:[#allocation17 + $0x28] sm:$0xff] (%p715_p0)   ;;  %v2315_v8 = vld [vmem:[#allocation17 + $0x20] sm:$0xff] (%p715_p0)   ;;  %vm770_vm3 = vcmask (%p715_p0), 60416  }
  0x88   : > { %s704_s25 = scalar_lea.vmem %s3304_s1, %s1954_s7  ;;  %s3332_s9 = scalar_lea.vmem [#allocation21], %s3004_s14  ;;  %2034 = vmatprep.mubr.msk.bf16.mxu1 (%p715_p0), %vm2709_vm1, %v2708_v2  ;;  %2044 = vmatprep.subr.bf16.mxu0 (%p715_p0), %v2708_v2  ;;  %v1060_v9 = vld [vmem:[%s599_s29] sm:$0xf] (%p715_p0)  ;;  %v2316_v10 = vld [vmem:[#allocation17 + $0x48] sm:$0xff] (%p715_p0)   ;;  %vm772_vm4 = vcmask (%p715_p0), 64512   ;;  %v2317_v16 = vld [vmem:[#allocation17 + $0x40] sm:$0xff] (%p715_p0)  }
  0x89   : > { %v3016_v0 = vld [vmem:[%s704_s25] sm:$0xf]  ;;  %720 = sbr.rel (!%p715_p0) target bundleno = 1306 (0x51a), region = 92  ;;  %2033 = vmatpush3.bf16.msra.mxu1 (%p715_p0), %v777_v4  ;;  %v2318_v57 = vld [vmem:[#allocation17 + $0x18] sm:$0xff] (%p715_p0)   ;;  %v976_v61 = vld [vmem:[%s590_s20] sm:$0xf] (%p715_p0) }
  0x8a   : > { %s3011_s12 = scalar_lea.vmem %s3360_s0, %s1953_s24  ;;  %2038 = vmatprep.subr.bf16.mxu1 (%p715_p0), %v2708_v2  ;;  %v1960_v25 = vld [vmem:[%s3314_s11] ss:$0 sm:$0xff] (%p715_p0)  ;;  %v1970_v26 = vld [vmem:[%s3314_s11 + $0x2] ss:$0 sm:$0xff] (%p715_p0)  ;;  %v2320_v62 = vld [vmem:[#allocation17 + $0x38] sm:$0xff] (%p715_p0)   ;;  %s3361_s25 = sld [smem:[#allocation40_spill]] (%p715_p0) }
  0x8b   : > { %v2319_v58 = vld [vmem:[#allocation17 + $0x10] sm:$0xff] (%p715_p0)   ;;  %v1144_v4 = vld [vmem:[%s608_s3] sm:$0xf] (%p715_p0)  ;;  %s831_s27 = sld [smem:[#allocation8]] (%p715_p0) }
  0x8c   : > { %v2321_v3 = vld [vmem:[#allocation17 + $0x30] sm:$0xff] (%p715_p0)  }
  0x8e   : > { %2029 = vmatmul.mubr.msk.bf16.vlgmr.msra.gmra.mxu0 %vm722_vm0, %v3016_v0 }
  0x8f   : > { %2048 = vmatprep.mubr.msk.bf16.mxu0 %vm2709_vm1, %v2708_v2  ;;  %2045 = vmatpush3.bf16.msra.mxu0 %v2312_v5 }
  0x90   : > { %2046 = vmatprep.subr.bf16.mxu0 %v2708_v2 }
  0x93   : > { %2047 = vmatpush3.bf16.msra.mxu0 %v2313_v6 }
  0x94   : > { %2060 = vmatprep.subr.bf16.mxu0 %v2708_v2 }
  0x96   : > { %2049 = vmatmul.mubr.msk.bf16.vlgmr.msra.gmra.mxu0 %vm722_vm0, %v3016_v0 }
  0x97   : > { %2061 = vmatpush3.bf16.msra.mxu0 %v2314_v7  ;;  %2064 = vmatprep.mubr.msk.bf16.mxu0 %vm2709_vm1, %v2708_v2 }
  0x98   : > { %2062 = vmatprep.subr.bf16.mxu0 %v2708_v2 }
  0x9b   : > { %2063 = vmatpush3.bf16.msra.mxu0 %v2315_v8 }
  0x9c   : > { %2076 = vmatprep.subr.bf16.mxu0 %v2708_v2 }
  0x9e   : > { %2065 = vmatmul.mubr.msk.bf16.vlgmr.msra.gmra.mxu0 %vm722_vm0, %v1060_v9 }
  0x9f   : > { %2077 = vmatpush3.bf16.msra.mxu0 %v2316_v10  ;;  %2080 = vmatprep.mubr.msk.bf16.mxu0 %vm2709_vm1, %v2708_v2 }
  0xa0   : > { %2078 = vmatprep.subr.bf16.mxu0 %v2708_v2 }
  0xa3   : > { %2079 = vmatpush3.bf16.msra.mxu0 %v2317_v16 }
 0x14e   : > { %v763_v11 = vpop.f32.mrf.mxu0 }
 0x14f   : > { %v769_v12 = vpack.c.bf16 %v763_v11, %v763_v11 }
 0x150   : > { %v2030_v13 = vpop.f32.mrf.mxu0 }
 0x151   : > { %771 = vst.msk [vmem:[#allocation2] sm:$0xf] %vm770_vm3, %v769_v12  ;;  %2035 = vmatmul.mubr.msk.bf16.vlgmr.msra.gmra.mxu1 %vm772_vm4, %v769_v12 }
 0x152   : > { %v766_v14 = vpop.f32.mrf.mxu0  ;;  %2040 = vmatprep.mubr.msk.bf16.mxu1 %vm2709_vm1, %v2708_v2 }
 0x154   : > { %v2031_v15 = vpop.f32.mrf.mxu0 }
 0x156   : > { %v955_v17 = vpop.f32.mrf.mxu0 }
 0x157   : > { %v3057_v27 = vadd.f32 %v1960_v25, %v955_v17 }
 0x158   : > { %v2050_v18 = vpop.f32.mrf.mxu0 }
 0x159   : > { %v961_v29 = vand.u32 2147483647, %v3057_v27 }
 0x15a   : > { %v958_v19 = vpop.f32.mrf.mxu0 }
 0x15b   : > { %v962_v31 = vmul.f32 %v961_v29, %v961_v29 }
 0x15c   : > { %v2051_v20 = vpop.f32.mrf.mxu0 }
 0x15d   : > { %v963_v33 = vmul.f32 %v962_v31, %v961_v29 }
 0x15e   : > { %v1123_v21 = vpop.f32.mrf.mxu0 }
 0x15f   : > { %v3059_v28 = vadd.f32 %v1970_v26, %v1123_v21  ;;  %v964_v35 = vsel %vm722_vm0, %v963_v33, 0.0 }
 0x160   : > { %v2066_v22 = vpop.f32.mrf.mxu0  ;;  %v965_v37 = vrot.slane %v964_v35, 4 }
 0x161   : > { %v1129_v30 = vand.u32 2147483647, %v3059_v28 }
 0x162   : > { %v1126_v23 = vpop.f32.mrf.mxu0  ;;  %v966_v39 = vadd.f32 %v965_v37, %v964_v35 }
 0x163   : > { %v1130_v32 = vmul.f32 %v1129_v30, %v1129_v30 }
 0x164   : > { %v2067_v24 = vpop.f32.mrf.mxu0  ;;  %v967_v41 = vrot.slane %v966_v39, 2 }
 0x165   : > { %v1131_v34 = vmul.f32 %v1130_v32, %v1129_v30 }
 0x166   : > { %v968_v43 = vadd.f32 %v967_v41, %v966_v39 }
 0x167   : > { %v1132_v36 = vsel %vm722_vm0, %v1131_v34, 0.0 }
 0x168   : > { %v1133_v38 = vrot.slane %v1132_v36, 4  ;;  %v969_v45 = vrot.slane %v968_v43, 1 }
 0x16a   : > { %v1134_v40 = vadd.f32 %v1133_v38, %v1132_v36  ;;  %v970_v47 = vadd.f32 %v969_v45, %v968_v43 }
 0x16c   : > { %v1135_v42 = vrot.slane %v1134_v40, 2  ;;  %v2100_v49 = vand.u32 2147483647, %v970_v47  ;;  %v2104_v5 = vand.u32 2147483648, %v970_v47  ;;  %vm2099_vm9 = vcmp.lt.f32.partialorder %v970_v47, 0.0 }
 0x16d   : > { %vm2098_vm11 = vcmp.eq.f32.partialorder %v970_v47, 0.0 }
 0x16e   : > { %v1136_v44 = vadd.f32 %v1135_v42, %v1134_v40  ;;  %2322 = vlog2.f32 %v2100_v49  ;;  %vm2108_vm5 = vweird.f32 %v2100_v49  ;;  %vm2110_vm7 = vcmp.eq.f32.partialorder %v2100_v49, 0.0 }
 0x16f   : > { %vm2101_vm13 = vcmp.eq.f32.partialorder %v2100_v49, inf }
 0x170   : > { %v1137_v46 = vrot.slane %v1136_v44, 1 }
 0x172   : > { %v1138_v48 = vadd.f32 %v1137_v46, %v1136_v44 }
 0x174   : > { %v2136_v50 = vand.u32 2147483647, %v1138_v48  ;;  %v2140_v7 = vand.u32 2147483648, %v1138_v48  ;;  %vm2135_vm10 = vcmp.lt.f32.partialorder %v1138_v48, 0.0  ;;  %vm2134_vm12 = vcmp.eq.f32.partialorder %v1138_v48, 0.0 }
 0x176   : > { %2324 = vlog2.f32 %v2136_v50  ;;  %vm2144_vm6 = vweird.f32 %v2136_v50  ;;  %vm2146_vm8 = vcmp.eq.f32.partialorder %v2136_v50, 0.0  ;;  %vm2137_vm14 = vcmp.eq.f32.partialorder %v2136_v50, inf }
 0x17b   : > { %v2323_v59 = vpop.eup %2322 }
 0x17c   : > { %v2105_v63 = vmul.f32 0.33333334, %v2323_v59 }
 0x17e   : > { %2326 = vpow2.f32 %v2105_v63 }
 0x183   : > { %v2325_v60 = vpop.eup %2324 }
 0x184   : > { %v2141_v1 = vmul.f32 0.33333334, %v2325_v60 }
 0x186   : > { %2328 = vpow2.f32 %v2141_v1 }
 0x18b   : > { %v2327_v6 = vpop.eup %2326 }
 0x18c   : > { %v2107_v9 = vor.u32 %v2327_v6, %v2104_v5 }
 0x18e   : > { %v2109_v11 = vsel %vm2108_vm5, %v970_v47, %v2107_v9 }
 0x18f   : > { %v2112_v13 = vsel %vm2110_vm7, %v2104_v5, %v2109_v11 }
 0x190   : > { %v2113_v15 = vsel %vm2099_vm9, nan, %v2112_v13 }
 0x191   : > { %v2114_v17 = vsel %vm2098_vm11, 0.0, %v2113_v15 }
 0x192   : > { %v2115_v19 = vsel %vm2101_vm13, inf, %v2114_v17 }
 0x193   : > { %v2329_v8 = vpop.eup %2328  ;;  %v972_v21 = vmax.f32 %v2115_v19, 1e-12 }
 0x194   : > { %v2143_v10 = vor.u32 %v2329_v8, %v2140_v7 }
 0x195   : > { %2330 = vrcp.f32 %v972_v21 }
 0x196   : > { %v2145_v12 = vsel %vm2144_vm6, %v1138_v48, %v2143_v10 }
 0x197   : > { %v2148_v14 = vsel %vm2146_vm8, %v2140_v7, %v2145_v12 }
 0x198   : > { %v2149_v16 = vsel %vm2135_vm10, nan, %v2148_v14 }
 0x199   : > { %v2150_v18 = vsel %vm2134_vm12, 0.0, %v2149_v16 }
 0x19a   : > { %v2151_v20 = vsel %vm2137_vm14, inf, %v2150_v18 }
 0x19b   : > { %v1140_v22 = vmax.f32 %v2151_v20, 1e-12 }
 0x19d   : > { %2332 = vrcp.f32 %v1140_v22 }
 0x1a2   : > { %v2331_v23 = vpop.eup %2330 }
 0x1a3   : > { %v3088_v25 = vmul.f32 %v2331_v23, %v3057_v27  ;;  %v1980_v27 = vld [vmem:[%s3314_s11 + $0x4] ss:$0 sm:$0xff] }
 0x1a5   : > { %v1308_v29 = vmul.f32 %v3088_v25, %v3088_v25 }
 0x1a7   : > { %v1309_v31 = vsel %vm722_vm0, %v1308_v29, 0.0 }
 0x1a8   : > { %1310 = vadd.xlane.f32.xlu0 %v1309_v31 }
 0x1aa   : > { %v2333_v24 = vpop.eup %2332 }
 0x1ab   : > { %v3091_v26 = vmul.f32 %v2333_v24, %v3059_v28 }
 0x1ad   : > { %v1327_v30 = vmul.f32 %v3091_v26, %v3091_v26 }
 0x1af   : > { %v1328_v32 = vsel %vm722_vm0, %v1327_v30, 0.0 }
 0x1b0   : > { %1329 = vadd.xlane.f32.xlu1 %v1328_v32 }
 0x211   : > { %v3065_v51 = vpop.f32.mrf.mxu1 }
 0x212   : > { %v819_v52 = vpack.c.bf16 %v3065_v51, %v3065_v51 }
 0x213   : > { %v2036_v53 = vpop.f32.mrf.mxu1 }
 0x214   : > { %2081 = vmatmul.mubr.msk.bf16.vlgmr.msra.gmra.mxu0 %vm722_vm0, %v819_v52  ;;  %v843_v54 = vsel %vm722_vm0, %v819_v52, 0  ;;  %v1965_v52 = vld [vmem:[%s3314_s11 + $0x1] ss:$0 sm:$0xff] }
 0x215   : > { %v816_v55 = vpop.f32.mrf.mxu1  ;;  %2039 = vmatpush3.bf16.xpose.msra.mxu1 %v843_v54 }
 0x216   : > { %2052 = vmatprep.subr.bf16.mxu1 %v2708_v2 }
 0x217   : > { %v2037_v56 = vpop.f32.mrf.mxu1 }
 0x21c   : > { %2041 = vmatmul.mubr.msk.bf16.vlgmr.msra.gmra.mxu1 %vm722_vm0, %v3016_v0 }
 0x21d   : > { %2053 = vmatpush3.bf16.msra.mxu1 %v2318_v57  ;;  %2056 = vmatprep.mubr.msk.bf16.mxu1 %vm2709_vm1, %v2708_v2 }
 0x21e   : > { %2054 = vmatprep.subr.bf16.mxu1 %v2708_v2 }
 0x221   : > { %2055 = vmatpush3.bf16.msra.mxu1 %v2319_v58 }
 0x222   : > { %2068 = vmatprep.subr.bf16.mxu1 %v2708_v2 }
 0x224   : > { %2057 = vmatmul.mubr.msk.bf16.vlgmr.msra.gmra.mxu1 %vm722_vm0, %v976_v61 }
 0x225   : > { %2069 = vmatpush3.bf16.msra.mxu1 %v2320_v62  ;;  %2072 = vmatprep.mubr.msk.bf16.mxu1 %vm2709_vm1, %v2708_v2 }
 0x226   : > { %2070 = vmatprep.subr.bf16.mxu1 %v2708_v2 }
 0x229   : > { %2071 = vmatpush3.bf16.msra.mxu1 %v2321_v3  ;;  %v1975_v3 = vld [vmem:[%s3314_s11 + $0x3] ss:$0 sm:$0xff] }
 0x22c   : > { %2073 = vmatmul.mubr.msk.bf16.vlgmr.msra.gmra.mxu1 %vm722_vm0, %v1144_v4 }
 0x2d4   : > { %v1287_v33 = vpop.f32.mrf.mxu0 }
 0x2d5   : > { %v3102_v34 = vadd.f32 %v1980_v27, %v1287_v33 }
 0x2d6   : > { %v2082_v28 = vpop.f32.mrf.mxu0 }
 0x2d7   : > { %v1293_v35 = vand.u32 2147483647, %v3102_v34 }
 0x2d8   : > { %v1290_v36 = vpop.f32.mrf.mxu0 }
 0x2d9   : > { %v1294_v37 = vmul.f32 %v1293_v35, %v1293_v35 }
 0x2da   : > { %v2083_v38 = vpop.f32.mrf.mxu0 }
 0x2db   : > { %v1295_v39 = vmul.f32 %v1294_v37, %v1293_v35 }
 0x2dc   : > { %v879_v40 = vpop.f32.mrf.mxu1 }
 0x2dd   : > { %v1296_v41 = vsel %vm722_vm0, %v1295_v39, 0.0  ;;  %v886_v42 = vmul.f32 0.001, %v879_v40 }
 0x2de   : > { %v1297_v43 = vrot.slane %v1296_v41, 4  ;;  %v2042_v44 = vpop.f32.mrf.mxu1 }
 0x2df   : > { %v888_v45 = vand.u32 2147483647, %v886_v42  ;;  %v887_v36 = vmin.f32 %v886_v42, 0.0 }
 0x2e0   : > { %v1298_v46 = vadd.f32 %v1297_v43, %v1296_v41  ;;  %v882_v47 = vpop.f32.mrf.mxu1 }
 0x2e1   : > { %v889_v48 = vsub.f32 0.0, %v888_v45 }
 0x2e2   : > { %v1299_v49 = vrot.slane %v1298_v46, 2  ;;  %v2043_v50 = vpop.f32.mrf.mxu1 }
 0x2e3   : > { %v890_v53 = vmul.f32 1.442695, %v889_v48 }
 0x2e4   : > { %v1300_v54 = vadd.f32 %v1299_v49, %v1298_v46  ;;  %v1039_v55 = vpop.f32.mrf.mxu1 }
 0x2e5   : > { %2334 = vpow2.f32 %v890_v53  ;;  %v3109_v56 = vadd.f32 %v1965_v52, %v1039_v55 }
 0x2e6   : > { %v1301_v57 = vrot.slane %v1300_v54, 1  ;;  %v2058_v58 = vpop.f32.mrf.mxu1 }
 0x2e7   : > { %v1045_v59 = vand.u32 2147483647, %v3109_v56 }
 0x2e8   : > { %v3112_v60 = vadd.f32 %v1301_v57, %v1300_v54  ;;  %v1042_v61 = vpop.f32.mrf.mxu1 }
 0x2e9   : > { %v1046_v62 = vmul.f32 %v1045_v59, %v1045_v59 }
 0x2ea   : > { %v3115_v63 = vand.u32 2147483647, %v3112_v60  ;;  %v2059_v1 = vpop.f32.mrf.mxu1  ;;  %v2176_v43 = vand.u32 2147483648, %v3112_v60  ;;  %vm2171_vm2 = vcmp.lt.f32.partialorder %v3112_v60, 0.0  ;;  %vm2170_vm3 = vcmp.eq.f32.partialorder %v3112_v60, 0.0 }
 0x2eb   : > { %v1047_v4 = vmul.f32 %v1046_v62, %v1045_v59 }
 0x2ec   : > { %2336 = vlog2.f32 %v3115_v63  ;;  %v1207_v5 = vpop.f32.mrf.mxu1  ;;  %vm2180_vm15 = vweird.f32 %v3115_v63  ;;  %vm2182_vm1 = vcmp.eq.f32.partialorder %v3115_v63, 0.0 }
 0x2ed   : > { %v1048_v6 = vsel %vm722_vm0, %v1047_v4, 0.0  ;;  %v3122_v7 = vadd.f32 %v1975_v3, %v1207_v5 }
 0x2ee   : > { %v1049_v8 = vrot.slane %v1048_v6, 4  ;;  %v2074_v9 = vpop.f32.mrf.mxu1 }
 0x2ef   : > { %v1213_v10 = vand.u32 2147483647, %v3122_v7 }
 0x2f0   : > { %v1050_v11 = vadd.f32 %v1049_v8, %v1048_v6  ;;  %v1210_v12 = vpop.f32.mrf.mxu1 }
 0x2f1   : > { %v1214_v13 = vmul.f32 %v1213_v10, %v1213_v10 }
 0x2f2   : > { %v2335_v14 = vpop.eup %2334  ;;  %v1051_v15 = vrot.slane %v1050_v11, 2  ;;  %v2075_v16 = vpop.f32.mrf.mxu1 }
 0x2f3   : > { %v892_v17 = vadd.f32 1.0, %v2335_v14  ;;  %v1215_v18 = vmul.f32 %v1214_v13, %v1213_v10 }
 0x2f4   : > { %v1052_v19 = vadd.f32 %v1051_v15, %v1050_v11 }
 0x2f5   : > { %2338 = vlog2.f32 %v892_v17  ;;  %v1216_v20 = vsel %vm722_vm0, %v1215_v18, 0.0 }
 0x2f6   : > { %v1053_v21 = vrot.slane %v1052_v19, 1  ;;  %v1217_v22 = vrot.slane %v1216_v20, 4 }
 0x2f8   : > { %v1054_v23 = vadd.f32 %v1053_v21, %v1052_v19  ;;  %v1218_v24 = vadd.f32 %v1217_v22, %v1216_v20 }
 0x2f9   : > { %v2337_v29 = vpop.eup %2336 }
 0x2fa   : > { %v2177_v30 = vmul.f32 0.33333334, %v2337_v29  ;;  %v2118_v31 = vand.u32 2147483647, %v1054_v23  ;;  %v1219_v32 = vrot.slane %v1218_v24, 2  ;;  %v2122_v53 = vand.u32 2147483648, %v1054_v23 }
 0x2fb   : > { %vm2117_vm7 = vcmp.lt.f32.partialorder %v1054_v23, 0.0  ;;  %vm2116_vm8 = vcmp.eq.f32.partialorder %v1054_v23, 0.0 }
 0x2fc   : > { %2340 = vpow2.f32 %v2177_v30  ;;  %v1220_v27 = vadd.f32 %v1219_v32, %v1218_v24  ;;  %vm2126_vm5 = vweird.f32 %v2118_v31  ;;  %vm2128_vm6 = vcmp.eq.f32.partialorder %v2118_v31, 0.0 }
 0x2fd   : > { %2342 = vlog2.f32 %v2118_v31  ;;  %vm2119_vm9 = vcmp.eq.f32.partialorder %v2118_v31, inf  ;;  %v1958_v31 = vld [vmem:[%s3361_s25] ss:$0 sm:$0xff] }
 0x2fe   : > { %v1221_v33 = vrot.slane %v1220_v27, 1 }
 0x300   : > { %v1222_v28 = vadd.f32 %v1221_v33, %v1220_v27 }
 0x302   : > { %v2339_v35 = vpop.eup %2338  ;;  %v2154_v38 = vand.u32 2147483647, %v1222_v28  ;;  %v2158_v4 = vand.u32 2147483648, %v1222_v28  ;;  %vm2153_vm12 = vcmp.lt.f32.partialorder %v1222_v28, 0.0  ;;  %vm2152_vm13 = vcmp.eq.f32.partialorder %v1222_v28, 0.0 }
 0x303   : > { %v894_v37 = vmul.f32 0.6931472, %v2339_v35  ;;  %v2710_v35 = vmov -inf  }
 0x304   : > { %2344 = vlog2.f32 %v2154_v38  ;;  %vm2162_vm10 = vweird.f32 %v2154_v38  ;;  %vm2164_vm11 = vcmp.eq.f32.partialorder %v2154_v38, 0.0  ;;  %vm2155_vm14 = vcmp.eq.f32.partialorder %v2154_v38, inf }
 0x305   : > { %v895_v39 = vsub.f32 %v887_v36, %v894_v37  ;;  %v1330_v36 = vpop.xlane.xlu1 %1329 }
 0x307   : > { %v896_v40 = vsel %vm772_vm4, %v895_v39, 0.0  ;;  %vm2173_vm4 = vcmp.eq.f32.partialorder %v3115_v63, inf }
 0x308   : > { %897 = vst [vmem:[%s3332_s9] sm:$0xff] %v896_v40 }
 0x309   : > { %v2341_v41 = vpop.eup %2340 }
 0x30a   : > { %v2343_v44 = vpop.eup %2342  ;;  %v2179_v45 = vor.u32 %v2341_v41, %v2176_v43 }
 0x30b   : > { %v2123_v46 = vmul.f32 0.33333334, %v2343_v44 }
 0x30c   : > { %v2181_v47 = vsel %vm2180_vm15, %v3112_v60, %v2179_v45  ;;  %vm840_vm15 = vcmask 7168  }
 0x30d   : > { %2346 = vpow2.f32 %v2123_v46  ;;  %v2184_v48 = vsel %vm2182_vm1, %v2176_v43, %v2181_v47  ;;  %1377 = vst.msk [vmem:[#allocation4] sm:$0xff] %vm840_vm15, %v2710_v35  ;;  %1378 = vst.msk [vmem:[#allocation6] sm:$0xff] %vm840_vm15, %v2710_v35  ;;  %v832_v46 = vstv %s831_s27  ;;  %vm1359_vm1 = vcmask 23552  }
 0x30e   : > { %v2185_v50 = vsel %vm2171_vm2, nan, %v2184_v48  ;;  %1379 = vst.msk [vmem:[#allocation5] sm:$0xff] %vm840_vm15, %v2708_v2  ;;  %1380 = vst.msk [vmem:[#allocation7] sm:$0xff] %vm840_vm15, %v2708_v2  ;;  %vm1362_vm2 = vcmask 31744  }
 0x30f   : > { %v2186_v52 = vsel %vm2170_vm3, 0.0, %v2185_v50 }
 0x310   : > { %v2187_v55 = vsel %vm2173_vm4, inf, %v2186_v52 }
 0x311   : > { %v2345_v42 = vpop.eup %2344  ;;  %v1304_v59 = vmax.f32 %v2187_v55, 1e-12 }
 0x312   : > { %v2159_v49 = vmul.f32 0.33333334, %v2345_v42 }
 0x314   : > { %2348 = vpow2.f32 %v2159_v49 }
 0x315   : > { %2350 = vrcp.f32 %v1304_v59 }
 0x31a   : > { %v2347_v54 = vpop.eup %2346 }
 0x31b   : > { %v2125_v57 = vor.u32 %v2347_v54, %v2122_v53 }
 0x31d   : > { %v2127_v58 = vsel %vm2126_vm5, %v1054_v23, %v2125_v57  ;;  %v1323_v23 = vmul.f32 %v3091_v26, %v3088_v25 }
 0x31e   : > { %v2130_v61 = vsel %vm2128_vm6, %v2122_v53, %v2127_v58 }
 0x31f   : > { %v2131_v62 = vsel %vm2117_vm7, nan, %v2130_v61 }
 0x320   : > { %v2132_v1 = vsel %vm2116_vm8, 0.0, %v2131_v62 }
 0x321   : > { %v2133_v3 = vsel %vm2119_vm9, inf, %v2132_v1  ;;  %v2349_v60 = vpop.eup %2348 }
 0x322   : > { %v1056_v5 = vmax.f32 %v2133_v3, 1e-12  ;;  %v2161_v6 = vor.u32 %v2349_v60, %v2158_v4  ;;  %v2351_v13 = vpop.eup %2350 }
 0x323   : > { %v1307_v15 = vmul.f32 %v2351_v13, %v3102_v34  ;;  %v1324_v34 = vsel %vm722_vm0, %v1323_v23, 0.0 }
 0x324   : > { %2352 = vrcp.f32 %v1056_v5  ;;  %v2163_v63 = vsel %vm2162_vm10, %v1222_v28, %v2161_v6 }
 0x325   : > { %v2166_v8 = vsel %vm2164_vm11, %v2158_v4, %v2163_v63  ;;  %v1349_v19 = vmul.f32 %v1307_v15, %v1307_v15  ;;  %v1345_v30 = vmul.f32 %v1307_v15, %v3088_v25 }
 0x326   : > { %v2167_v9 = vsel %vm2153_vm12, nan, %v2166_v8 }
 0x327   : > { %v2168_v10 = vsel %vm2152_vm13, 0.0, %v2167_v9  ;;  %v1350_v22 = vsel %vm722_vm0, %v1349_v19, 0.0  ;;  %v1346_v32 = vsel %vm722_vm0, %v1345_v30, 0.0 }
 0x328   : > { %v2169_v11 = vsel %vm2155_vm14, inf, %v2168_v10 }
 0x329   : > { %v1224_v12 = vmax.f32 %v2169_v11, 1e-12 }
 0x32b   : > { %2354 = vrcp.f32 %v1224_v12 }
 0x331   : > { %v2353_v14 = vpop.eup %2352 }
 0x332   : > { %v1059_v16 = vmul.f32 %v2353_v14, %v3109_v56 }
 0x334   : > { %v1316_v17 = vmul.f32 %v1059_v16, %v1059_v16  ;;  %v1312_v56 = vmul.f32 %v1059_v16, %v3088_v25 }
 0x336   : > { %v1317_v18 = vsel %vm722_vm0, %v1316_v17, 0.0  ;;  %v1313_v26 = vsel %vm722_vm0, %v1312_v56, 0.0 }
 0x337   : > { %1318 = vadd.xlane.f32.xlu0 %v1317_v18 }
 0x338   : > { %v2355_v20 = vpop.eup %2354 }
 0x339   : > { %v1227_v21 = vmul.f32 %v2355_v20, %v3122_v7  ;;  %v827_v7 = vmul.f32 %v1958_v31, %v3065_v51  ;;  %v1311_v51 = vpop.xlane.xlu0 %1310 }
 0x33a   : > { %v1331_v39 = vmul.f32 %v1330_v36, %v1311_v51 }
 0x33b   : > { %1351 = vadd.xlane.f32.xlu0 %v1350_v22  ;;  %v1338_v24 = vmul.f32 %v1227_v21, %v1227_v21  ;;  %v1334_v27 = vmul.f32 %v1227_v21, %v3088_v25  ;;  %v828_v28 = vsel %vm722_vm0, %v827_v7, 0.0 }
 0x33d   : > { %v1339_v29 = vsel %vm722_vm0, %v1338_v24, 0.0  ;;  %v1335_v33 = vsel %vm722_vm0, %v1334_v27, 0.0  ;;  %vm1357_vm0 = vcmask 15360  }
 0x33e   : > { %1340 = vadd.xlane.f32.xlu1 %v1339_v29 }
 0x33f   : > { %1325 = vadd.xlane.f32.xlu0 %v1324_v34 }
 0x342   : > { %1314 = vadd.xlane.f32.xlu1 %v1313_v26 }
 0x343   : > { %1347 = vadd.xlane.f32.xlu0 %v1346_v32 }
 0x346   : > { %1336 = vadd.xlane.f32.xlu1 %v1335_v33 }
 0x347   : > { %829 = vadd.xlane.f32.xlu0 %v828_v28 }
 0x3c0   : > { %v1319_v25 = vpop.xlane.xlu0 %1318 }
 0x3c1   : > { %v1320_v37 = vmul.f32 %v1319_v25, %v1311_v51 }
 0x3c3   : > { %2356 = vrsqrt.f32 %v1320_v37 }
 0x3c4   : > { %v1352_v38 = vpop.xlane.xlu0 %1351  ;;  %2358 = vrsqrt.f32 %v1331_v39 }
 0x3c5   : > { %v1353_v40 = vmul.f32 %v1352_v38, %v1311_v51 }
 0x3c7   : > { %v1341_v41 = vpop.xlane.xlu1 %1340  ;;  %2360 = vrsqrt.f32 %v1353_v40 }
 0x3c8   : > { %v1326_v43 = vpop.xlane.xlu0 %1325  ;;  %v1342_v44 = vmul.f32 %v1341_v41, %v1311_v51 }
 0x3ca   : > { %2362 = vrsqrt.f32 %v1342_v44 }
 0x3cb   : > { %v1315_v2 = vpop.xlane.xlu1 %1314 }
 0x3cc   : > { %v1348_v45 = vpop.xlane.xlu0 %1347 }
 0x3cf   : > { %v1337_v58 = vpop.xlane.xlu1 %1336 }
 0x3d0   : > { %v830_v47 = vpop.xlane.xlu0 %829  ;;  %v2357_v48 = vpop.eup %2356 }
 0x3d1   : > { %v833_v42 = vadd.f32 %v832_v46, %v830_v47  ;;  %v2359_v52 = vpop.eup %2358  ;;  %v1322_v53 = vmul.f32 %v2357_v48, %v1315_v2 }
 0x3d2   : > { %v1333_v57 = vmul.f32 %v2359_v52, %v1326_v43 }
 0x3d3   : > { %v834_v49 = vsub.f32 0.0, %v833_v42 }
 0x3d4   : > { %v2361_v54 = vpop.eup %2360  ;;  %v1356_v61 = vsel %vm840_vm15, %v1322_v53, %v1333_v57 }
 0x3d5   : > { %v835_v50 = vmul.f32 1.442695, %v834_v49  ;;  %v1355_v62 = vmul.f32 %v2361_v54, %v1348_v45 }
 0x3d7   : > { %2364 = vpow2.f32 %v835_v50  ;;  %v2363_v55 = vpop.eup %2362 }
 0x3d8   : > { %v1344_v59 = vmul.f32 %v2363_v55, %v1337_v58 }
 0x3da   : > { %v1358_v1 = vsel %vm1357_vm0, %v1356_v61, %v1344_v59 }
 0x3db   : > { %v1360_v3 = vsel %vm1359_vm1, %v1358_v1, %v1355_v62 }
 0x3dc   : > { %v1361_v4 = vmul.f32 0.01, %v1360_v3 }
 0x3de   : > { %v1363_v60 = vsel %vm1362_vm2, %v1361_v4, -inf }
 0x3df   : > { %1364 = vmax.xlane.f32.xlu1 %v1363_v60 }
 0x3e4   : > { %v2365_v5 = vpop.eup %2364 }
 0x3e5   : > { %v837_v6 = vadd.f32 1.0, %v2365_v5 }
 0x3e7   : > { %2366 = vrcp.f32 %v837_v6 }
 0x3f4   : > { %v2367_v63 = vpop.eup %2366 }
 0x3f5   : > { %841 = vst.msk [vmem:[#allocation3] sm:$0xff] %vm840_vm15, %v2367_v63 }
 0x468   : > { %v1365_v8 = vpop.xlane.xlu1 %1364 }
 0x469   : > { %v1366_v9 = vsub.f32 %v1361_v4, %v1365_v8 }
 0x46b   : > { %v1367_v10 = vmul.f32 1.442695, %v1366_v9 }
 0x46d   : > { %2368 = vpow2.f32 %v1367_v10 }
 0x47a   : > { %v2369_v11 = vpop.eup %2368 }
 0x47b   : > { %v1369_v12 = vsel %vm1362_vm2, %v2369_v11, 0.0 }
 0x47c   : > { %1370 = vadd.xlane.f32.xlu1 %v1369_v12 }
 0x505   : > { %v1371_v13 = vpop.xlane.xlu1 %1370 }
 0x506   : > { %2370 = vlog2.f32 %v1371_v13 }
 0x513   : > { %v2371_v14 = vpop.eup %2370 }
 0x514   : > { %v1373_v15 = vmul.f32 0.6931472, %v2371_v14 }
 0x516   : > { %v1374_v16 = vsub.f32 %v1366_v9, %v1373_v15 }
 0x518   : > { %v1375_v17 = vsel %vm1362_vm2, %v1374_v16, 0.0 }
 0x519   : > { %1376 = vst [vmem:[%s689_s28] sm:$0xff] %v1375_v17 }
 0x51a PF: > { %v1453_v18 = vld [vmem:[%s3011_s12] sm:$0xff]  ;;  %s3362_s24 = sld [smem:[#allocation38_spill]]  ;;  %v2711_v20 = vmov 0   ;;  %v2712_v21 = vmov 0.0   ;;  %vm2713_vm3 = vmmov 0   ;;  %vm1404_vm4 = vcmask 261120  }
 0x51b   : > { %2372 = vset.pattern.permute.xlu0 %v2711_v20  ;;  %2084 = vmatprep.subr.bf16.mxu0 %v2712_v21  ;;  %v1448_v23 = vlaneseq  ;;  %vm1465_vm6 = vcmask 1043456   ;;  %v1460_v31 = vld [vmem:[#allocation2] sm:$0xf]  ;;  %vm1461_vm7 = vcmask 64512   ;;  %s3363_s7 = sld [smem:[#allocation39_spill]]  ;;  %p1989_p1 = scmp.ne.s32.totalorder %s2683_s18, 0 }
 0x51c   : > { %1455 = vperm.xlu0 %2372, %v1453_v18   ;;  %2088 = vmatprep.mubr.msk.bf16.mxu0 %vm2713_vm3, %v2712_v21 }
 0x51d   : > { %2092 = vmatprep.subr.bf16.mxu1 %v2712_v21  ;;  %2094 = vmatprep.mubr.msk.bf16.mxu1 %vm2713_vm3, %v2712_v21  ;;  %v1449_v24 = vand.u32 127, %v1448_v23 }
 0x520   : > { %v2373_v19 = vld [vmem:[%s3362_s24 + $0x8] sm:$0xff]   ;;  %v2374_v22 = vld [vmem:[%s3362_s24] sm:$0xff]  }
 0x521   : > { %2085 = vmatpush3.bf16.msra.mxu0 %v2373_v19  ;;  %v1984_v7 = vld [vmem:[%s3363_s7] ss:$0 sm:$0xff] }
 0x522   : > { %2086 = vmatprep.subr.bf16.mxu0 %v2712_v21 }
 0x525   : > { %2087 = vmatpush3.bf16.msra.mxu0 %v2374_v22 }
 0x528   : > { %2089 = vmatmul.mubr.msk.bf16.vlgmr.msra.gmra.mxu0 %vm1404_vm4, %v3016_v0 }
 0x597   : > { %v1456_v29 = vpop.permute.xlu0 %1455 }
 0x598   : > { %vm1457_vm5 = vcmp.eq.s32.totalorder %v1456_v29, %v1449_v24 }
 0x599   : > { %v1458_v34 = vsel %vm1457_vm5, 1.0, %v2712_v21 }
 0x59a   : > { %v1459_v56 = vpack.c.bf16 %v1458_v34, %v1458_v34 }
 0x59c   : > { %v1467_v30 = vsel %vm1465_vm6, %v1459_v56, 0 }
 0x59d   : > { %2093 = vmatpush3.bf16.msra.mxu1 %v1467_v30 }
 0x5a0   : > { %2095 = vmatmul.mubr.msk.bf16.vlgmr.msra.gmra.mxu1 %vm1461_vm7, %v1460_v31 }
 0x5e8   : > { %v1442_v26 = vpop.f32.mrf.mxu0 }
 0x5e9   : > { %v3180_v32 = vadd.f32 %v1984_v7, %v1442_v26 }
 0x5ea   : > { %v2090_v0 = vpop.f32.mrf.mxu0 }
 0x5ec   : > { %v1445_v27 = vpop.f32.mrf.mxu0 }
 0x5ee   : > { %v2091_v33 = vpop.f32.mrf.mxu0 }
 0x660   : > { %v3182_v28 = vpop.f32.mrf.mxu1 }
 0x662   : > { %v2096_v35 = vpop.f32.mrf.mxu1  ;;  %1511 = sbr.rel (%p1989_p1) target bundleno = 2066 (0x812), region = 96 }
 0x664   : > { %v1506_v51 = vpop.f32.mrf.mxu1 }
 0x666   : > { %v2097_v25 = vpop.f32.mrf.mxu1 }
 0x667   : > { %1513 = vmax.xlane.f32.xlu0 %v3180_v32  ;;  %v2714_v36 = vmov 0   ;;  %v1512_v37 = vld [vmem:[#allocation4] sm:$0xff]  ;;  %vm1532_vm8 = vcmask 7168   ;;  %v1535_v40 = vld [vmem:[#allocation6] sm:$0xff]  ;;  %v1516_v57 = vld [vmem:[#allocation5] sm:$0xff] }
 0x668   : > { %2375 = vset.pattern.permute.xlu1 %v2714_v36  ;;  %2376 = vset.pattern.permute.xlu0 %v2714_v36  ;;  %v1539_v62 = vld [vmem:[#allocation7] sm:$0xff] }
 0x66b   : > { %1536 = vmax.xlane.f32.xlu0 %v3182_v28 }
 0x6f0   : > { %v1514_v38 = vpop.xlane.xlu0 %1513 }
 0x6f1   : > { %v1515_v39 = vmax.f32 %v1512_v37, %v1514_v38 }
 0x6f3   : > { %v1517_v41 = vsub.f32 %v1512_v37, %v1515_v39  ;;  %1534 = vst.msk [vmem:[#allocation4] sm:$0xff] %vm1532_vm8, %v1515_v39  ;;  %1523 = vperm.xlu1 %2375, %v1515_v39  }
 0x6f4   : > { %v1537_v43 = vpop.xlane.xlu0 %1536 }
 0x6f5   : > { %v1538_v44 = vmax.f32 %v1535_v40, %v1537_v43  ;;  %v1518_v53 = vmul.f32 1.442695, %v1517_v41 }
 0x6f7   : > { %v1540_v45 = vsub.f32 %v1535_v40, %v1538_v44  ;;  %1556 = vst.msk [vmem:[#allocation6] sm:$0xff] %vm1532_vm8, %v1538_v44  ;;  %1546 = vperm.xlu1 %2375, %v1538_v44  }
 0x6f9   : > { %v1541_v54 = vmul.f32 1.442695, %v1540_v45 }
 0x76e   : > { %v1524_v46 = vpop.permute.xlu1 %1523 }
 0x76f   : > { %v1526_v47 = vsub.f32 %v3180_v32, %v1524_v46 }
 0x771   : > { %v1527_v42 = vmul.f32 1.442695, %v1526_v47 }
 0x772   : > { %v1547_v2 = vpop.permute.xlu1 %1546 }
 0x773   : > { %2377 = vpow2.f32 %v1527_v42  ;;  %v1549_v48 = vsub.f32 %v3182_v28, %v1547_v2 }
 0x775   : > { %v1550_v49 = vmul.f32 1.442695, %v1549_v48 }
 0x777   : > { %2379 = vpow2.f32 %v1550_v49 }
 0x778   : > { %2381 = vpow2.f32 %v1518_v53 }
 0x779   : > { %2383 = vpow2.f32 %v1541_v54 }
 0x780   : > { %v2378_v50 = vpop.eup %2377 }
 0x781   : > { %1529 = vadd.xlane.f32.xlu0 %v2378_v50 }
 0x784   : > { %v2380_v52 = vpop.eup %2379 }
 0x785   : > { %1552 = vadd.xlane.f32.xlu1 %v2380_v52  ;;  %v2382_v55 = vpop.eup %2381 }
 0x786   : > { %v1520_v58 = vmul.f32 %v2382_v55, %v1516_v57  ;;  %v2384_v59 = vpop.eup %2383 }
 0x787   : > { %v1543_v3 = vmul.f32 %v2384_v59, %v1539_v62 }
 0x80a   : > { %v1530_v61 = vpop.xlane.xlu0 %1529 }
 0x80b   : > { %v1531_v1 = vadd.f32 %v1530_v61, %v1520_v58 }
 0x80d   : > { %1533 = vst.msk [vmem:[#allocation5] sm:$0xff] %vm1532_vm8, %v1531_v1 }
 0x80e   : > { %v1553_v4 = vpop.xlane.xlu1 %1552 }
 0x80f   : > { %v1554_v60 = vadd.f32 %v1553_v4, %v1543_v3 }
 0x811   : > { %1555 = vst.msk [vmem:[#allocation7] sm:$0xff] %vm1532_vm8, %v1554_v60 }
 0x812 PF: > { %p1990_p4 = scmp.ne.s32.totalorder %s2683_s18, 1 }
 0x814   : > { %1560 = sbr.rel (%p1990_p4) target bundleno = 2259 (0x8d3), region = 100 }
 0x819   : > { %v1563_v5 = vld [vmem:[#allocation5] sm:$0xff]  ;;  %v2715_v6 = vmov 0   ;;  %v1568_v63 = vld [vmem:[#allocation7] sm:$0xff]  ;;  %v1562_v11 = vld [vmem:[#allocation4] sm:$0xff] }
 0x81a   : > { %2385 = vset.pattern.permute.xlu0 %v2715_v6  ;;  %2387 = vlog2.f32 %v1563_v5  ;;  %2386 = vset.pattern.permute.xlu1 %v2715_v6  ;;  %v1561_v8 = vld [vmem:[#allocation3] sm:$0xff]  ;;  %v1567_v14 = vld [vmem:[#allocation6] sm:$0xff] }
 0x81b   : > { %2389 = vlog2.f32 %v1568_v63  ;;  %1582 = vperm.xlu1 %2386, %v1561_v8   ;;  %v1586_v9 = vsub.f32 1.0, %v1561_v8 }
 0x81f   : > { %1597 = vperm.xlu1 %2386, %v1586_v9  }
 0x827   : > { %v2388_v10 = vpop.eup %2387 }
 0x828   : > { %v2390_v12 = vpop.eup %2389  ;;  %v1565_v13 = vmul.f32 0.6931472, %v2388_v10 }
 0x829   : > { %v1570_v15 = vmul.f32 0.6931472, %v2390_v12 }
 0x82a   : > { %v1566_v16 = vadd.f32 %v1565_v13, %v1562_v11 }
 0x82b   : > { %v1571_v17 = vadd.f32 %v1570_v15, %v1567_v14 }
 0x82c   : > { %1574 = vperm.xlu0 %2385, %v1566_v16  }
 0x830   : > { %1589 = vperm.xlu0 %2385, %v1571_v17  }
 0x896   : > { %v1583_v24 = vpop.permute.xlu1 %1582 }
 0x89a   : > { %v1598_v56 = vpop.permute.xlu1 %1597 }
 0x8a7   : > { %v1575_v18 = vpop.permute.xlu0 %1574 }
 0x8a8   : > { %v1577_v19 = vsub.f32 %v3180_v32, %v1575_v18 }
 0x8aa   : > { %v1578_v20 = vmul.f32 1.442695, %v1577_v19 }
 0x8ab   : > { %v1590_v21 = vpop.permute.xlu0 %1589 }
 0x8ac   : > { %v1592_v22 = vsub.f32 %v3182_v28, %v1590_v21  ;;  %2391 = vpow2.f32 %v1578_v20 }
 0x8ae   : > { %v1593_v23 = vmul.f32 1.442695, %v1592_v22 }
 0x8b0   : > { %2393 = vpow2.f32 %v1593_v23 }
 0x8b9   : > { %v2392_v29 = vpop.eup %2391 }
 0x8ba   : > { %v1585_v30 = vmul.f32 %v2392_v29, %v1583_v24 }
 0x8bd   : > { %v2394_v34 = vpop.eup %2393 }
 0x8be   : > { %v1600_v31 = vmul.f32 %v2394_v34, %v1598_v56 }
 0x8c0   : > { %v1601_v7 = vadd.f32 %v1600_v31, %v1585_v30 }
 0x8c2   : > { %2395 = vlog2.f32 %v1601_v7 }
 0x8cf   : > { %v2396_v26 = vpop.eup %2395 }
 0x8d0   : > { %v1603_v0 = vmul.f32 0.6931472, %v2396_v26 }
 0x8d2   : > { %1604 = vst [vmem:[%s682_s10] sm:$0xff] %v1603_v0 }
 0x8d3 PF: > { %s3199_s8 = sshll.u32 %s2687_s19, 7  ;;  %s3365_s6 = sld [smem:[#allocation43_spill]] }
 0x8d4   : > { %s1644_s27 = sshll.u32 %s689_s28, 4  ;;  %s1611_s29 = scalar_lea.sflag [#allocation20], %s2983_s26  ;;  %s1645_s27 = int_to_ptr.vmem [resolvable:$true] %s1644_s27 }
 0x8d5   : > { %s2535_s15 = scalar_lea.vmem %s1645_s27, 128  ;;  %s2716_s13 = smov [#allocation19]  }
 0x8d6   : > { %p2536_p5 = scmp.ne.s32.totalorder %s1645_s27, %s2535_s15  ;;  %s2539_s20 = sshll.u32 %s2716_s13, 4  ;;  %s2540_s20 = int_to_ptr.vmem [resolvable:$false] %s2539_s20 }
 0x8d7   : > { %s2541_s12 = scalar_lea.vmem %s2540_s20, 256  ;;  %p2542_p13 = scmp.lt.s32.totalorder %s1645_s27, %s2540_s20 }
 0x8d8   : > { %p2537_p12 = pnand %p2536_p5, %p2881_p11  ;;  %p2543_p3 = scmp.lt.s32.totalorder %s2541_s12, %s2535_s15 }
 0x8d9   : > { %s1642_s25 = scalar_lea.hbm %s3365_s6, %s3199_s8 }
 0x8da   : > { %p2538_p10 = pneg %p2537_p12  ;;  %p2544_p2 = por %p2543_p3, %p2542_p13 }
 0x8dc   : > { %p2545_p6 = pnand %p2544_p2, %p2538_p10 }
 0x8de   : > { %2548 = shalt.err (!%p2545_p6)
}
 0x8df   : > { %s2549_s19 = scalar_lea.hbm %s1642_s25, 128  ;;  %s2553_s7 = scalar_lea.hbm %s3365_s6, 256 }
 0x8e0   : > { %p2550_p7 = scmp.ne.s32.totalorder %s1642_s25, %s2549_s19  ;;  %p2554_p0 = scmp.lt.s32.totalorder %s1642_s25, %s3365_s6 }
 0x8e1   : > { %p2555_p1 = scmp.lt.s32.totalorder %s2553_s7, %s2549_s19 }
 0x8e2   : > { %p2551_p9 = pnand %p2550_p7, %p2881_p11 }
 0x8e3   : > { %p2556_p4 = por %p2555_p1, %p2554_p0 }
 0x8e4   : > { %p2552_p8 = pneg %p2551_p9 }
 0x8e6   : > { %p2557_p5 = pnand %p2556_p4, %p2552_p8 }
 0x8e8   : > { %2560 = shalt.err (!%p2557_p5)
}
 0x8e9   : > { %2201 = dma.vmem_to_hbm [thread:$0]  (%p2881_p11), %s1645_s27, 128, %s1642_s25, %s1611_s29  }
 0x8ea   : > { %s3366_s20 = sld [smem:[#allocation42_spill]]  ;;  %s1631_s19 = sshll.u32 %s682_s10, 4  ;;  %s1632_s19 = int_to_ptr.vmem [resolvable:$true] %s1631_s19 }
 0x8eb   : > { %s3368_s23 = sld [smem:[#allocation44_spill]]  ;;  %s1606_s9 = scalar_lea.sflag [#allocation11], %s2971_s30 }
 0x8ec   : > { %s2561_s0 = scalar_lea.vmem %s1632_s19, 128  ;;  %s2717_s25 = smov [#allocation18]  }
 0x8ed   : > { %p2562_p12 = scmp.ne.s32.totalorder %s1632_s19, %s2561_s0  ;;  %s2565_s27 = sshll.u32 %s2717_s25, 4  ;;  %s2566_s27 = int_to_ptr.vmem [resolvable:$false] %s2565_s27 }
 0x8ee   : > { %s2567_s15 = scalar_lea.vmem %s2566_s27, 256  ;;  %p2568_p3 = scmp.lt.s32.totalorder %s1632_s19, %s2566_s27 }
 0x8ef   : > { %p2563_p10 = pnand %p2562_p12, %p2881_p11  ;;  %p2569_p2 = scmp.lt.s32.totalorder %s2567_s15, %s2561_s0 }
 0x8f0   : > { %s3367_s12 = smov %s3366_s20  ;;  %s3226_s28 = scalar_lea.hbm %s3366_s20, %s3199_s8 }
 0x8f1   : > { %s3234_s22 = scalar_lea.hbm %s3368_s23, %s3199_s8  ;;  %p2564_p13 = pneg %p2563_p10 }
 0x8f2   : > { %p2570_p6 = por %p2569_p2, %p2568_p3 }
 0x8f4   : > { %p2571_p7 = pnand %p2570_p6, %p2564_p13 }
 0x8f6   : > { %2574 = shalt.err (!%p2571_p7)
}
 0x8f7   : > { %s2575_s10 = scalar_lea.hbm %s3226_s28, 128  ;;  %s2579_s13 = scalar_lea.hbm %s3367_s12, 256 }
 0x8f8   : > { %p2576_p9 = scmp.ne.s32.totalorder %s3226_s28, %s2575_s10  ;;  %p2580_p1 = scmp.lt.s32.totalorder %s3226_s28, %s3367_s12 }
 0x8f9   : > { %p2581_p4 = scmp.lt.s32.totalorder %s2579_s13, %s2575_s10 }
 0x8fa   : > { %p2577_p8 = pnand %p2576_p9, %p2881_p11 }
 0x8fb   : > { %p2582_p5 = por %p2581_p4, %p2580_p1 }
 0x8fc   : > { %p2578_p0 = pneg %p2577_p8 }
 0x8fe   : > { %p2583_p12 = pnand %p2582_p5, %p2578_p0 }
 0x900   : > { %2586 = shalt.err (!%p2583_p12)
}
 0x901   : > { %2200 = dma.vmem_to_hbm [thread:$0]  (%p2881_p11), %s1632_s19, 128, %s3226_s28, %s1606_s9  }
 0x902   : > { %s3369_s0 = scalar_lea.vmem [#allocation21], %s3004_s14  ;;  %s2718_s27 = smov [#allocation21]  }
 0x903   : > { %s1657_s7 = sshll.u32 %s3369_s0, 4  ;;  %s2591_s15 = sshll.u32 %s2718_s27, 4  ;;  %s1658_s7 = int_to_ptr.vmem [resolvable:$true] %s1657_s7  ;;  %s2592_s15 = int_to_ptr.vmem [resolvable:$false] %s2591_s15 }
 0x904   : > { %s2587_s25 = scalar_lea.vmem %s1658_s7, 128  ;;  %s2593_s10 = scalar_lea.vmem %s2592_s15, 256 }
 0x905   : > { %p2588_p10 = scmp.ne.s32.totalorder %s1658_s7, %s2587_s25  ;;  %p2594_p2 = scmp.lt.s32.totalorder %s1658_s7, %s2592_s15 }
 0x906   : > { %p2595_p6 = scmp.lt.s32.totalorder %s2593_s10, %s2587_s25 }
 0x907   : > { %p2589_p13 = pnand %p2588_p10, %p2881_p11 }
 0x908   : > { %p2596_p7 = por %p2595_p6, %p2594_p2 }
 0x909   : > { %p2590_p3 = pneg %p2589_p13 }
 0x90b   : > { %p2597_p9 = pnand %p2596_p7, %p2590_p3 }
 0x90d   : > { %2600 = shalt.err (!%p2597_p9)
}
 0x90e   : > { %s2601_s14 = scalar_lea.hbm %s3234_s22, 128  ;;  %s2605_s19 = scalar_lea.hbm %s3368_s23, 256 }
 0x90f   : > { %p2602_p8 = scmp.ne.s32.totalorder %s3234_s22, %s2601_s14  ;;  %p2606_p4 = scmp.lt.s32.totalorder %s3234_s22, %s3368_s23 }
 0x910   : > { %p2607_p5 = scmp.lt.s32.totalorder %s2605_s19, %s2601_s14 }
 0x911   : > { %p2603_p0 = pnand %p2602_p8, %p2881_p11 }
 0x912   : > { %p2608_p12 = por %p2607_p5, %p2606_p4 }
 0x913   : > { %p2604_p1 = pneg %p2603_p0 }
 0x915   : > { %p2609_p10 = pnand %p2608_p12, %p2604_p1 }
 0x917   : > { %2612 = shalt.err (!%p2609_p10)
}
 0x918   : > { %2202 = dma.vmem_to_hbm [thread:$0]  (%p2881_p11), %s1658_s7, 128, %s3234_s22, %s1611_s29  }
 0x919 PF: > { %s3370_s13 = sld [smem:[#allocation28_spill]]  ;;  %p2236_p13 = scmp.ge.s32.totalorder %s2699_s21, 2 }
 0x91a   : > { %s3371_s20 = sld [smem:[#allocation31_spill]] }
 0x91f   : > { %s1669_s3 = sand.u32 1, %s3370_s13  }
 0x920   : > { %p3372_p3 = scmp.ne.s32.totalorder %s3371_s20, 0  ;;  %s1670_s0 = scalar_lea.sflag [#allocation11], %s1669_s3 }
 0x922   : > { %p2224_p2 = pnand %p2236_p13, %p3372_p3 }
 0x924   : > { %p2225_p6 = pneg %p2224_p2 }
 0x926   : > { %2662 = dma.done.wait (%p2225_p6), %s1670_s0, 128  }
 0x927   : > { %2664 = vsyncadd (%p2225_p6), %s1670_s0, 4294967168  ;;  %s3373_s25 = sadd.s32 4294967294, %s2699_s21  }
 0x928   : > { %s1678_s27 = sand.u32 1, %s3373_s25  }
 0x929   : > { %s1679_s18 = scalar_lea.sflag [#allocation20], %s1678_s27 }
 0x92a   : > { %2666 = dma.done.wait (%p2225_p6), %s1679_s18, 256  }
 0x92b   : > { %2668 = vsyncadd (%p2225_p6), %s1679_s18, 4294967040  ;;  %s41_s21 = sadd.s32 1, %s2699_s21   ;;  %s3374_s26 = sld [smem:[#allocation35_spill]] }
 0x92c   : > { %p38_p11 = scmp.ge.s32.totalorder %s41_s21, 6   ;;  %s3375_s18 = sld [smem:[#allocation29_spill]] }
 0x92d   : > { %s3376_s19 = sld [smem:[#allocation30_spill]]  ;;  %s3379_s15 = smov %s2675_s16 }
 0x92e   : > { %s3377_s9 = sld [smem:[#allocation32_spill]]  ;;  %s3380_s16 = smov %s2679_s17 }
 0x92f   : > { %s3378_s20 = sld [smem:[#allocation34_spill]]  ;;  %40 = sbr.rel (!%p38_p11) target bundleno = 24 (0x18), region = 218 }
 0x931   : > { %s3381_s17 = smov %s3374_s26 }
 0x934   :  { %1693 = vsyncpa [#allocation10], 1 }
 0x935   :  { %1695 = vsyncpa [#allocation10 + $0x1], 1 }
 0x936   :  { %1696 = vsyncpa [#allocation13], 1 }
 0x937   :  { %1698 = vsyncpa [#allocation13 + $0x1], 1 }
 0x938   :  { %1699 = vsyncpa [#allocation16], 1 }
 0x939   :  { %1701 = vsyncpa [#allocation16 + $0x1], 1 }
 0x93a   :  { %1702 = vsyncpa [#allocation11], 1 }
 0x93b   :  { %1704 = vsyncpa [#allocation11 + $0x1], 1 }
 0x93c   :  { %1705 = vsyncpa [#allocation20], 1 }
 0x93d   :  { %1707 = vsyncpa [#allocation20 + $0x1], 1 }

</bundles_post_ra>
